<compile_context>
chip_gen: v7x
topology: tpu7x:2x2x1
jax: 0.10.0
libtpu: 0.0.40
codegen_flags: <defaults>
</compile_context>

<pallas_src>
import functools
import math

import jax
import jax.numpy as jnp
from jax.experimental import pallas as pl
from jax.experimental.pallas import tpu as pltpu


# ----------------------------- in-kernel helpers ---------------------------- #

def _ln(x, g, b, eps):
    """LayerNorm over the last (lane) axis; statistics in f32."""
    mu = jnp.mean(x, axis=-1, keepdims=True)
    xc = x - mu
    var = jnp.mean(xc * xc, axis=-1, keepdims=True)
    return xc * jax.lax.rsqrt(var + eps) * g + b


# ------------------------------ Pallas kernel ------------------------------- #

def _encoder_stack_kernel(mask_ref, we_ref, pe_ref, te_ref, eg_ref, eb_ref,
                          wqkv_ref, bqkv_ref, wo_ref, bo_ref,
                          ln1g_ref, ln1b_ref,
                          wi_ref, bi_ref, wf_ref, bf_ref,
                          ln2g_ref, ln2b_ref,
                          o_ref, *, B, S, H, Dh, eps, scale):
    """Whole RoBERTa encoder: grid axis 0 == layer index (sequential carry).

    The residual stream (B*S, D) lives in the output block, which stays
    resident in VMEM across all grid steps (constant output index).
    """
    D = H * Dh
    l = pl.program_id(0)

    # --- layer 0: fused (word + position + type) add + embedding LayerNorm ---
    @pl.when(l == 0)
    def _():
        x = (we_ref[...].astype(jnp.float32)
             + pe_ref[...].astype(jnp.float32)
             + te_ref[...].astype(jnp.float32))          # te is (1, D), broadcast
        o_ref[...] = _ln(x, eg_ref[...], eb_ref[...], eps).astype(o_ref.dtype)

    # --- residual-stream carry (VMEM-resident output block) ---
    h = o_ref[...].astype(jnp.float32)                                    # (B*S, D)

    # --- fused Q/K/V projection: one MXU pass, 3*D-wide output ---
    qkv = (jnp.dot(h, wqkv_ref[0].astype(jnp.float32),
                   preferred_element_type=jnp.float32)
           + bqkv_ref[0])                                                 # (B*S, 3D)

    # --- additive attention-mask bias, hoisted out of the head loop ---
    mask = mask_ref[...].astype(jnp.float32)                              # (B, S)
    bias = jnp.broadcast_to((1.0 - mask)[:, None, :], (B, S, S)) * (-1e9)

    # --- multi-head self-attention; head merge fused into out-proj ---
    wo = wo_ref[0].astype(jnp.float32)                                    # (D, D)
    attn_out = jnp.zeros((B * S, D), jnp.float32)
    for hd in range(H):                                                   # unrolled
        qh = qkv[:, hd * Dh:(hd + 1) * Dh].reshape(B, S, Dh)
        kh = qkv[:, D + hd * Dh:D + (hd + 1) * Dh].reshape(B, S, Dh)
        vh = qkv[:, 2 * D + hd * Dh:2 * D + (hd + 1) * Dh].reshape(B, S, Dh)
        s = jnp.einsum('bqd,bkd->bqk', qh, kh,
                       preferred_element_type=jnp.float32) * scale + bias  # (B,S,S)
        s = s - jnp.max(s, axis=-1, keepdims=True)
        p = jnp.exp(s)
        p = p * pl.reciprocal(jnp.sum(p, axis=-1, keepdims=True), approx=True)
        ctx_h = jnp.einsum('bqk,bkd->bqd', p, vh,
                           preferred_element_type=jnp.float32).reshape(B * S, Dh)
        # ctx @ Wo == sum_h ctx_h @ Wo[h*Dh:(h+1)*Dh, :]  (no lane concat needed)
        attn_out = attn_out + jnp.dot(ctx_h, wo[hd * Dh:(hd + 1) * Dh, :],
                                      preferred_element_type=jnp.float32)
    attn_out = attn_out + bo_ref[0]

    # --- fused residual + post-LN ---
    h1 = _ln(attn_out + h, ln1g_ref[0], ln1b_ref[0], eps)

    # --- FFN + fused residual + post-LN ---
    inter = (jnp.dot(h1, wi_ref[0], preferred_element_type=jnp.float32)
             + bi_ref[0])
    # TODO(synk): HF RoBERTa uses exact erf-GELU; tanh approximation used here.
    inter = jax.nn.gelu(inter, approximate=True)
    ffn = (jnp.dot(inter, wf_ref[0], preferred_element_type=jnp.float32)
           + bf_ref[0])
    h2 = _ln(ffn + h1, ln2g_ref[0], ln2b_ref[0], eps)

    o_ref[...] = h2.astype(o_ref.dtype)


def encoder_stack(mask_f, we, pe, te, emb_g, emb_b, stacked,
                  *, B, S, H, Dh, L, eps=1e-5):
    D = H * Dh
    scale = 1.0 / math.sqrt(Dh)
    kern = functools.partial(_encoder_stack_kernel,
                             B=B, S=S, H=H, Dh=Dh, eps=eps, scale=scale)

    def const2(shape):
        # full-array block, same block index for every layer (DMA'd once)
        return pl.BlockSpec(shape, lambda l: (0, 0))

    def per_layer(tail_shape):
        # one layer-slice of the stacked weight per grid step
        return pl.BlockSpec((1,) + tail_shape, lambda l: (l, 0, 0))

    I = stacked["wi"].shape[-1]

    in_specs = [
        const2((B, S)),            # mask
        const2((B * S, D)),        # word-emb gather
        const2((B * S, D)),        # position-emb gather
        const2((1, D)),            # type-emb row
        const2((1, D)),            # emb LN gamma
        const2((1, D)),            # emb LN beta
        per_layer((D, 3 * D)),     # wqkv
        per_layer((1, 3 * D)),     # bqkv
        per_layer((D, D)),         # wo
        per_layer((1, D)),         # bo
        per_layer((1, D)),         # ln1 gamma
        per_layer((1, D)),         # ln1 beta
        per_layer((D, I)),         # wi
        per_layer((1, I)),         # bi
        per_layer((I, D)),         # wf
        per_layer((1, D)),         # bf
        per_layer((1, D)),         # ln2 gamma
        per_layer((1, D)),         # ln2 beta
    ]

    return pl.pallas_call(
        kern,
        out_shape=jax.ShapeDtypeStruct((B * S, D), jnp.float32),
        grid_spec=pltpu.PrefetchScalarGridSpec(
            num_scalar_prefetch=0,
            grid=(L,),
            in_specs=in_specs,
            out_specs=pl.BlockSpec((B * S, D), lambda l: (0, 0)),
        ),
        compiler_params=pltpu.CompilerParams(
            dimension_semantics=("arbitrary",)),
    )(mask_f, we, pe, te, emb_g, emb_b,
      stacked["wqkv"], stacked["bqkv"], stacked["wo"], stacked["bo"],
      stacked["ln1_g"], stacked["ln1_b"],
      stacked["wi"], stacked["bi"], stacked["wf"], stacked["bf"],
      stacked["ln2_g"], stacked["ln2_b"])


# --------------------------- parameters / model ---------------------------- #

def init_params(key, cfg):
    D, I, L = cfg["hidden"], cfg["inter"], cfg["n_layers"]

    def nrm(k, shape):
        return 0.02 * jax.random.normal(k, shape, jnp.float32)

    keys = iter(jax.random.split(key, 16 + 8 * L))
    zeros = lambda *s: jnp.zeros(s, jnp.float32)
    ones = lambda *s: jnp.ones(s, jnp.float32)

    layers = []
    for _ in range(L):
        wq = nrm(next(keys), (D, D))
        wk = nrm(next(keys), (D, D))
        wv = nrm(next(keys), (D, D))
        layers.append({
            # Q/K/V projections fused into a single (D, 3D) weight.
            "wqkv": jnp.concatenate([wq, wk, wv], axis=1),
            "bqkv": zeros(1, 3 * D),
            "wo": nrm(next(keys), (D, D)), "bo": zeros(1, D),
            "ln1_g": ones(1, D), "ln1_b": zeros(1, D),
            "wi": nrm(next(keys), (D, I)), "bi": zeros(1, I),
            "wf": nrm(next(keys), (I, D)), "bf": zeros(1, D),
            "ln2_g": ones(1, D), "ln2_b": zeros(1, D),
        })
    # Stack per-layer params on a leading layer axis so the full encoder is a
    # single pallas_call with grid=(L,).
    stacked = {k: jnp.stack([lyr[k] for lyr in layers]) for k in layers[0]}

    params = {
        "word_emb": nrm(next(keys), (cfg["vocab_size"], D)),
        "pos_emb":  nrm(next(keys), (cfg["max_pos"], D)),
        "type_emb": nrm(next(keys), (cfg["type_vocab"], D)),
        "emb_ln_g": ones(1, D), "emb_ln_b": zeros(1, D),
        "layers": stacked,
        "cls_dense_w": nrm(next(keys), (D, D)), "cls_dense_b": zeros(D),
        "cls_out_w": nrm(next(keys), (D, cfg["num_labels"])),
        "cls_out_b": zeros(cfg["num_labels"]),
    }
    return params


def bert_classifier_forward(params, input_ids, attention_mask, cfg):
    """Equivalent of BERTClassifier.forward(input_ids, attention_mask) -> logits."""
    B, S = input_ids.shape
    D, H, L = cfg["hidden"], cfg["n_heads"], cfg["n_layers"]
    Dh = D // H
    pad = cfg["pad_token_id"]

    # RoBERTa position ids (created from input_ids, offset by padding_idx).
    mask_i = (input_ids != pad).astype(jnp.int32)
    position_ids = jnp.cumsum(mask_i, axis=1) * mask_i + pad

    # Embedding gathers stay in XLA; adds + LayerNorm + all layers are 1 kernel.
    we = params["word_emb"][input_ids].reshape(B * S, D)
    pe = params["pos_emb"][position_ids].reshape(B * S, D)
    te = params["type_emb"][0].reshape(1, D)       # token_type_ids are all zero

    mask_f = attention_mask.astype(jnp.float32)    # (B, S), 1.0 = keep

    h = encoder_stack(mask_f, we, pe, te,
                      params["emb_ln_g"], params["emb_ln_b"],
                      params["layers"], B=B, S=S, H=H, Dh=Dh, L=L)

    # RobertaClassificationHead (<s> token, dense+tanh, out_proj) on a (B, 2)
    # problem: plain XLA (dropout is identity in eval mode).
    cls = h.reshape(B, S, D)[:, 0, :]
    x = jnp.tanh(cls @ params["cls_dense_w"] + params["cls_dense_b"])
    logits = x @ params["cls_out_w"] + params["cls_out_b"]
    # TODO(synk): HF also returns a cross-entropy loss when labels are supplied;
    # only logits are produced here.
    return logits


# ---------------------------------- main ----------------------------------- #

if __name__ == "__main__":
    cfg = dict(vocab_size=100, max_pos=16, type_vocab=1, hidden=32, n_layers=2,
               n_heads=4, inter=64, num_labels=2, pad_token_id=1)

    key = jax.random.PRNGKey(0)
    k_param, k_ids = jax.random.split(key)
    params = init_params(k_param, cfg)

    B, S = 2, 8
    input_ids = jax.random.randint(k_ids, (B, S), 3, cfg["vocab_size"], dtype=jnp.int32)
    lengths = jnp.array([S, S - 2])
    attention_mask = (jnp.arange(S)[None, :] < lengths[:, None]).astype(jnp.int32)
    input_ids = jnp.where(attention_mask == 1, input_ids, cfg["pad_token_id"])

    logits = bert_classifier_forward(params, input_ids, attention_mask, cfg)
    jax.block_until_ready(logits)
    assert logits.shape == (B, cfg["num_labels"])
    print("KERNEL_OK")
</pallas_src>

<mosaic_0001>
module attributes {stable_mosaic.version = 11 : i64} {
  func.func @_encoder_stack_kernel(%arg0: i32, %arg1: memref<2x8xf32, #tpu.memory_space<vmem>>, %arg2: memref<16x32xf32, #tpu.memory_space<vmem>>, %arg3: memref<16x32xf32, #tpu.memory_space<vmem>>, %arg4: memref<1x32xf32, #tpu.memory_space<vmem>>, %arg5: memref<1x32xf32, #tpu.memory_space<vmem>>, %arg6: memref<1x32xf32, #tpu.memory_space<vmem>>, %arg7: memref<1x32x96xf32, #tpu.memory_space<vmem>>, %arg8: memref<1x1x96xf32, #tpu.memory_space<vmem>>, %arg9: memref<1x32x32xf32, #tpu.memory_space<vmem>>, %arg10: memref<1x1x32xf32, #tpu.memory_space<vmem>>, %arg11: memref<1x1x32xf32, #tpu.memory_space<vmem>>, %arg12: memref<1x1x32xf32, #tpu.memory_space<vmem>>, %arg13: memref<1x32x64xf32, #tpu.memory_space<vmem>>, %arg14: memref<1x1x64xf32, #tpu.memory_space<vmem>>, %arg15: memref<1x64x32xf32, #tpu.memory_space<vmem>>, %arg16: memref<1x1x32xf32, #tpu.memory_space<vmem>>, %arg17: memref<1x1x32xf32, #tpu.memory_space<vmem>>, %arg18: memref<1x1x32xf32, #tpu.memory_space<vmem>>, %arg19: memref<16x32xf32, #tpu.memory_space<vmem>>) attributes {dimension_semantics = [#tpu.dimension_semantics<arbitrary>], iteration_bounds = array<i64: 2>, scalar_prefetch = 0 : i64, scratch_operands = 0 : i64, tpu.core_type = #tpu.core_type<tc>, window_params = [{pipeline_mode = #tpu.pipeline_mode<synchronous>, transform_indices = @transform_0, window_bounds = array<i64: 2, 8>}, {pipeline_mode = #tpu.pipeline_mode<synchronous>, transform_indices = @transform_1, window_bounds = array<i64: 16, 32>}, {pipeline_mode = #tpu.pipeline_mode<synchronous>, transform_indices = @transform_2, window_bounds = array<i64: 16, 32>}, {pipeline_mode = #tpu.pipeline_mode<synchronous>, transform_indices = @transform_3, window_bounds = array<i64: 1, 32>}, {pipeline_mode = #tpu.pipeline_mode<synchronous>, transform_indices = @transform_4, window_bounds = array<i64: 1, 32>}, {pipeline_mode = #tpu.pipeline_mode<synchronous>, transform_indices = @transform_5, window_bounds = array<i64: 1, 32>}, {transform_indices = @transform_6, window_bounds = array<i64: 1, 32, 96>}, {transform_indices = @transform_7, window_bounds = array<i64: 1, 1, 96>}, {transform_indices = @transform_8, window_bounds = array<i64: 1, 32, 32>}, {transform_indices = @transform_9, window_bounds = array<i64: 1, 1, 32>}, {transform_indices = @transform_10, window_bounds = array<i64: 1, 1, 32>}, {transform_indices = @transform_11, window_bounds = array<i64: 1, 1, 32>}, {transform_indices = @transform_12, window_bounds = array<i64: 1, 32, 64>}, {transform_indices = @transform_13, window_bounds = array<i64: 1, 1, 64>}, {transform_indices = @transform_14, window_bounds = array<i64: 1, 64, 32>}, {transform_indices = @transform_15, window_bounds = array<i64: 1, 1, 32>}, {transform_indices = @transform_16, window_bounds = array<i64: 1, 1, 32>}, {transform_indices = @transform_17, window_bounds = array<i64: 1, 1, 32>}, {pipeline_mode = #tpu.pipeline_mode<synchronous>, transform_indices = @transform_18, window_bounds = array<i64: 16, 32>}]} {
    %c0_i32 = arith.constant 0 : i32
    %0 = arith.cmpi eq, %arg0, %c0_i32 : i32
    %1 = arith.extui %0 : i1 to i32
    %c0_i32_0 = arith.constant 0 : i32
    %2 = arith.cmpi ne, %1, %c0_i32_0 : i32
    scf.if %2 {
      %c0_85 = arith.constant 0 : index
      %c0_86 = arith.constant 0 : index
      %204 = vector.load %arg2[%c0_85, %c0_86] : memref<16x32xf32, #tpu.memory_space<vmem>>, vector<16x32xf32>
      %c0_87 = arith.constant 0 : index
      %c0_88 = arith.constant 0 : index
      %205 = vector.load %arg3[%c0_87, %c0_88] : memref<16x32xf32, #tpu.memory_space<vmem>>, vector<16x32xf32>
      %206 = arith.addf %204, %205 : vector<16x32xf32>
      %c0_89 = arith.constant 0 : index
      %c0_90 = arith.constant 0 : index
      %207 = vector.load %arg4[%c0_89, %c0_90] : memref<1x32xf32, #tpu.memory_space<vmem>>, vector<1x32xf32>
      %208 = vector.broadcast %207 : vector<1x32xf32> to vector<16x32xf32>
      %209 = arith.addf %206, %208 : vector<16x32xf32>
      %c0_91 = arith.constant 0 : index
      %c0_92 = arith.constant 0 : index
      %210 = vector.load %arg5[%c0_91, %c0_92] : memref<1x32xf32, #tpu.memory_space<vmem>>, vector<1x32xf32>
      %c0_93 = arith.constant 0 : index
      %c0_94 = arith.constant 0 : index
      %211 = vector.load %arg6[%c0_93, %c0_94] : memref<1x32xf32, #tpu.memory_space<vmem>>, vector<1x32xf32>
      %cst_95 = arith.constant dense<0.000000e+00> : vector<16xf32>
      %212 = vector.multi_reduction <add>, %209, %cst_95 [1] : vector<16x32xf32> to vector<16xf32>
      %213 = vector.shape_cast %212 : vector<16xf32> to vector<16x1xf32>
      %cst_96 = arith.constant 3.200000e+01 : f32
      %214 = vector.broadcast %cst_96 : f32 to vector<16x1xf32>
      %215 = arith.divf %213, %214 : vector<16x1xf32>
      %216 = vector.broadcast %215 : vector<16x1xf32> to vector<16x32xf32>
      %217 = arith.subf %209, %216 : vector<16x32xf32>
      %218 = arith.mulf %217, %217 : vector<16x32xf32>
      %cst_97 = arith.constant dense<0.000000e+00> : vector<16xf32>
      %219 = vector.multi_reduction <add>, %218, %cst_97 [1] : vector<16x32xf32> to vector<16xf32>
      %220 = vector.shape_cast %219 : vector<16xf32> to vector<16x1xf32>
      %cst_98 = arith.constant 3.200000e+01 : f32
      %221 = vector.broadcast %cst_98 : f32 to vector<16x1xf32>
      %222 = arith.divf %220, %221 : vector<16x1xf32>
      %cst_99 = arith.constant 9.99999974E-6 : f32
      %223 = vector.broadcast %cst_99 : f32 to vector<16x1xf32>
      %224 = arith.addf %222, %223 : vector<16x1xf32>
      %225 = math.rsqrt %224 : vector<16x1xf32>
      %226 = vector.broadcast %225 : vector<16x1xf32> to vector<16x32xf32>
      %227 = arith.mulf %217, %226 : vector<16x32xf32>
      %228 = vector.broadcast %210 : vector<1x32xf32> to vector<16x32xf32>
      %229 = arith.mulf %227, %228 : vector<16x32xf32>
      %230 = vector.broadcast %211 : vector<1x32xf32> to vector<16x32xf32>
      %231 = arith.addf %229, %230 : vector<16x32xf32>
      %c0_100 = arith.constant 0 : index
      %c0_101 = arith.constant 0 : index
      %232 = vector.load %arg19[%c0_100, %c0_101] : memref<16x32xf32, #tpu.memory_space<vmem>>, vector<16x32xf32>
      tpu.vector_store %arg19[%c0_100, %c0_101], %231 {strides = array<i32>} : memref<16x32xf32, #tpu.memory_space<vmem>>, vector<16x32xf32>,
    } else {
    }
    %c0 = arith.constant 0 : index
    %c0_1 = arith.constant 0 : index
    %3 = vector.load %arg19[%c0, %c0_1] : memref<16x32xf32, #tpu.memory_space<vmem>>, vector<16x32xf32>
    %c0_2 = arith.constant 0 : index
    %c0_3 = arith.constant 0 : index
    %c0_4 = arith.constant 0 : index
    %4 = vector.load %arg7[%c0_2, %c0_3, %c0_4] : memref<1x32x96xf32, #tpu.memory_space<vmem>>, vector<1x32x96xf32>
    %5 = vector.shape_cast %4 : vector<1x32x96xf32> to vector<32x96xf32>
    %cst = arith.constant dense<0.000000e+00> : vector<16x96xf32>
    %6 = tpu.matmul %3, %5, %cst {dimension_numbers = #tpu.dot_dimension_numbers<[1], [0], [0], [1], [0, 0, 1, 1], [], []>} : vector<16x32xf32>, vector<32x96xf32>, vector<16x96xf32> -> vector<16x96xf32>
    %c0_5 = arith.constant 0 : index
    %c0_6 = arith.constant 0 : index
    %c0_7 = arith.constant 0 : index
    %7 = vector.load %arg8[%c0_5, %c0_6, %c0_7] : memref<1x1x96xf32, #tpu.memory_space<vmem>>, vector<1x1x96xf32>
    %8 = vector.shape_cast %7 : vector<1x1x96xf32> to vector<1x96xf32>
    %9 = vector.broadcast %8 : vector<1x96xf32> to vector<16x96xf32>
    %10 = arith.addf %6, %9 : vector<16x96xf32>
    %c0_8 = arith.constant 0 : index
    %c0_9 = arith.constant 0 : index
    %11 = vector.load %arg1[%c0_8, %c0_9] : memref<2x8xf32, #tpu.memory_space<vmem>>, vector<2x8xf32>
    %cst_10 = arith.constant 1.000000e+00 : f32
    %12 = vector.broadcast %cst_10 : f32 to vector<2x8xf32>
    %13 = arith.subf %12, %11 : vector<2x8xf32>
    %14 = vector.shape_cast %13 : vector<2x8xf32> to vector<2x1x8xf32>
    %15 = vector.shape_cast %14 : vector<2x1x8xf32> to vector<2x1x8xf32>
    %16 = vector.broadcast %15 : vector<2x1x8xf32> to vector<2x8x8xf32>
    %cst_11 = arith.constant -1.000000e+09 : f32
    %17 = vector.broadcast %cst_11 : f32 to vector<2x8x8xf32>
    %18 = arith.mulf %16, %17 : vector<2x8x8xf32>
    %c0_12 = arith.constant 0 : index
    %c0_13 = arith.constant 0 : index
    %c0_14 = arith.constant 0 : index
    %19 = vector.load %arg9[%c0_12, %c0_13, %c0_14] : memref<1x32x32xf32, #tpu.memory_space<vmem>>, vector<1x32x32xf32>
    %20 = vector.shape_cast %19 : vector<1x32x32xf32> to vector<32x32xf32>
    %cst_15 = arith.constant 0.000000e+00 : f32
    %21 = vector.broadcast %cst_15 : f32 to vector<16x32xf32>
    %22 = vector.extract_strided_slice %10 {offsets = [0, 0], sizes = [16, 8], strides = [1, 1]} : vector<16x96xf32> to vector<16x8xf32>
    %23 = vector.shape_cast %22 : vector<16x8xf32> to vector<2x8x8xf32>
    %24 = vector.extract_strided_slice %10 {offsets = [0, 32], sizes = [16, 8], strides = [1, 1]} : vector<16x96xf32> to vector<16x8xf32>
    %25 = vector.shape_cast %24 : vector<16x8xf32> to vector<2x8x8xf32>
    %26 = vector.extract_strided_slice %10 {offsets = [0, 64], sizes = [16, 8], strides = [1, 1]} : vector<16x96xf32> to vector<16x8xf32>
    %27 = vector.shape_cast %26 : vector<16x8xf32> to vector<2x8x8xf32>
    "tpu.trace_start"() <{level = 10 : i32, message = "bqd,bkd->bqk"}> : () -> ()
    %cst_16 = arith.constant dense<0.000000e+00> : vector<2x8x8xf32>
    %28 = tpu.matmul %23, %25, %cst_16 {dimension_numbers = #tpu.dot_dimension_numbers<[2], [2], [1], [1], [0, 0, 0, 1, 1, 1], [0], [0]>} : vector<2x8x8xf32>, vector<2x8x8xf32>, vector<2x8x8xf32> -> vector<2x8x8xf32>
    "tpu.trace_stop"() : () -> ()
    %cst_17 = arith.constant 0.353553385 : f32
    %29 = vector.broadcast %cst_17 : f32 to vector<2x8x8xf32>
    %30 = arith.mulf %28, %29 : vector<2x8x8xf32>
    %31 = arith.addf %30, %18 : vector<2x8x8xf32>
    %cst_18 = arith.constant dense<0xFF800000> : vector<2x8xf32>
    %32 = vector.multi_reduction <maximumf>, %31, %cst_18 [2] : vector<2x8x8xf32> to vector<2x8xf32>
    %33 = vector.shape_cast %32 : vector<2x8xf32> to vector<2x8x1xf32>
    %34 = vector.broadcast %33 : vector<2x8x1xf32> to vector<2x8x8xf32>
    %35 = arith.subf %31, %34 : vector<2x8x8xf32>
    %36 = math.exp %35 : vector<2x8x8xf32>
    %cst_19 = arith.constant dense<0.000000e+00> : vector<2x8xf32>
    %37 = vector.multi_reduction <add>, %36, %cst_19 [2] : vector<2x8x8xf32> to vector<2x8xf32>
    %38 = vector.shape_cast %37 : vector<2x8xf32> to vector<2x8x1xf32>
    %39 = tpu.reciprocal %38 {approx = true} : vector<2x8x1xf32> -> vector<2x8x1xf32>
    %40 = vector.broadcast %39 : vector<2x8x1xf32> to vector<2x8x8xf32>
    %41 = arith.mulf %36, %40 : vector<2x8x8xf32>
    "tpu.trace_start"() <{level = 10 : i32, message = "bqk,bkd->bqd"}> : () -> ()
    %cst_20 = arith.constant dense<0.000000e+00> : vector<2x8x8xf32>
    %42 = tpu.matmul %41, %27, %cst_20 {dimension_numbers = #tpu.dot_dimension_numbers<[2], [1], [1], [2], [0, 0, 0, 1, 1, 2], [0], [0]>} : vector<2x8x8xf32>, vector<2x8x8xf32>, vector<2x8x8xf32> -> vector<2x8x8xf32>
    "tpu.trace_stop"() : () -> ()
    %43 = vector.shape_cast %42 : vector<2x8x8xf32> to vector<16x8xf32>
    %44 = vector.extract_strided_slice %20 {offsets = [0, 0], sizes = [8, 32], strides = [1, 1]} : vector<32x32xf32> to vector<8x32xf32>
    %cst_21 = arith.constant dense<0.000000e+00> : vector<16x32xf32>
    %45 = tpu.matmul %43, %44, %cst_21 {dimension_numbers = #tpu.dot_dimension_numbers<[1], [0], [0], [1], [0, 0, 1, 1], [], []>} : vector<16x8xf32>, vector<8x32xf32>, vector<16x32xf32> -> vector<16x32xf32>
    %46 = arith.addf %21, %45 : vector<16x32xf32>
    %47 = vector.extract_strided_slice %10 {offsets = [0, 8], sizes = [16, 8], strides = [1, 1]} : vector<16x96xf32> to vector<16x8xf32>
    %48 = vector.shape_cast %47 : vector<16x8xf32> to vector<2x8x8xf32>
    %49 = vector.extract_strided_slice %10 {offsets = [0, 40], sizes = [16, 8], strides = [1, 1]} : vector<16x96xf32> to vector<16x8xf32>
    %50 = vector.shape_cast %49 : vector<16x8xf32> to vector<2x8x8xf32>
    %51 = vector.extract_strided_slice %10 {offsets = [0, 72], sizes = [16, 8], strides = [1, 1]} : vector<16x96xf32> to vector<16x8xf32>
    %52 = vector.shape_cast %51 : vector<16x8xf32> to vector<2x8x8xf32>
    "tpu.trace_start"() <{level = 10 : i32, message = "bqd,bkd->bqk"}> : () -> ()
    %cst_22 = arith.constant dense<0.000000e+00> : vector<2x8x8xf32>
    %53 = tpu.matmul %48, %50, %cst_22 {dimension_numbers = #tpu.dot_dimension_numbers<[2], [2], [1], [1], [0, 0, 0, 1, 1, 1], [0], [0]>} : vector<2x8x8xf32>, vector<2x8x8xf32>, vector<2x8x8xf32> -> vector<2x8x8xf32>
    "tpu.trace_stop"() : () -> ()
    %cst_23 = arith.constant 0.353553385 : f32
    %54 = vector.broadcast %cst_23 : f32 to vector<2x8x8xf32>
    %55 = arith.mulf %53, %54 : vector<2x8x8xf32>
    %56 = arith.addf %55, %18 : vector<2x8x8xf32>
    %cst_24 = arith.constant dense<0xFF800000> : vector<2x8xf32>
    %57 = vector.multi_reduction <maximumf>, %56, %cst_24 [2] : vector<2x8x8xf32> to vector<2x8xf32>
    %58 = vector.shape_cast %57 : vector<2x8xf32> to vector<2x8x1xf32>
    %59 = vector.broadcast %58 : vector<2x8x1xf32> to vector<2x8x8xf32>
    %60 = arith.subf %56, %59 : vector<2x8x8xf32>
    %61 = math.exp %60 : vector<2x8x8xf32>
    %cst_25 = arith.constant dense<0.000000e+00> : vector<2x8xf32>
    %62 = vector.multi_reduction <add>, %61, %cst_25 [2] : vector<2x8x8xf32> to vector<2x8xf32>
    %63 = vector.shape_cast %62 : vector<2x8xf32> to vector<2x8x1xf32>
    %64 = tpu.reciprocal %63 {approx = true} : vector<2x8x1xf32> -> vector<2x8x1xf32>
    %65 = vector.broadcast %64 : vector<2x8x1xf32> to vector<2x8x8xf32>
    %66 = arith.mulf %61, %65 : vector<2x8x8xf32>
    "tpu.trace_start"() <{level = 10 : i32, message = "bqk,bkd->bqd"}> : () -> ()
    %cst_26 = arith.constant dense<0.000000e+00> : vector<2x8x8xf32>
    %67 = tpu.matmul %66, %52, %cst_26 {dimension_numbers = #tpu.dot_dimension_numbers<[2], [1], [1], [2], [0, 0, 0, 1, 1, 2], [0], [0]>} : vector<2x8x8xf32>, vector<2x8x8xf32>, vector<2x8x8xf32> -> vector<2x8x8xf32>
    "tpu.trace_stop"() : () -> ()
    %68 = vector.shape_cast %67 : vector<2x8x8xf32> to vector<16x8xf32>
    %69 = vector.extract_strided_slice %20 {offsets = [8, 0], sizes = [8, 32], strides = [1, 1]} : vector<32x32xf32> to vector<8x32xf32>
    %cst_27 = arith.constant dense<0.000000e+00> : vector<16x32xf32>
    %70 = tpu.matmul %68, %69, %cst_27 {dimension_numbers = #tpu.dot_dimension_numbers<[1], [0], [0], [1], [0, 0, 1, 1], [], []>} : vector<16x8xf32>, vector<8x32xf32>, vector<16x32xf32> -> vector<16x32xf32>
    %71 = arith.addf %46, %70 : vector<16x32xf32>
    %72 = vector.extract_strided_slice %10 {offsets = [0, 16], sizes = [16, 8], strides = [1, 1]} : vector<16x96xf32> to vector<16x8xf32>
    %73 = vector.shape_cast %72 : vector<16x8xf32> to vector<2x8x8xf32>
    %74 = vector.extract_strided_slice %10 {offsets = [0, 48], sizes = [16, 8], strides = [1, 1]} : vector<16x96xf32> to vector<16x8xf32>
    %75 = vector.shape_cast %74 : vector<16x8xf32> to vector<2x8x8xf32>
    %76 = vector.extract_strided_slice %10 {offsets = [0, 80], sizes = [16, 8], strides = [1, 1]} : vector<16x96xf32> to vector<16x8xf32>
    %77 = vector.shape_cast %76 : vector<16x8xf32> to vector<2x8x8xf32>
    "tpu.trace_start"() <{level = 10 : i32, message = "bqd,bkd->bqk"}> : () -> ()
    %cst_28 = arith.constant dense<0.000000e+00> : vector<2x8x8xf32>
    %78 = tpu.matmul %73, %75, %cst_28 {dimension_numbers = #tpu.dot_dimension_numbers<[2], [2], [1], [1], [0, 0, 0, 1, 1, 1], [0], [0]>} : vector<2x8x8xf32>, vector<2x8x8xf32>, vector<2x8x8xf32> -> vector<2x8x8xf32>
    "tpu.trace_stop"() : () -> ()
    %cst_29 = arith.constant 0.353553385 : f32
    %79 = vector.broadcast %cst_29 : f32 to vector<2x8x8xf32>
    %80 = arith.mulf %78, %79 : vector<2x8x8xf32>
    %81 = arith.addf %80, %18 : vector<2x8x8xf32>
    %cst_30 = arith.constant dense<0xFF800000> : vector<2x8xf32>
    %82 = vector.multi_reduction <maximumf>, %81, %cst_30 [2] : vector<2x8x8xf32> to vector<2x8xf32>
    %83 = vector.shape_cast %82 : vector<2x8xf32> to vector<2x8x1xf32>
    %84 = vector.broadcast %83 : vector<2x8x1xf32> to vector<2x8x8xf32>
    %85 = arith.subf %81, %84 : vector<2x8x8xf32>
    %86 = math.exp %85 : vector<2x8x8xf32>
    %cst_31 = arith.constant dense<0.000000e+00> : vector<2x8xf32>
    %87 = vector.multi_reduction <add>, %86, %cst_31 [2] : vector<2x8x8xf32> to vector<2x8xf32>
    %88 = vector.shape_cast %87 : vector<2x8xf32> to vector<2x8x1xf32>
    %89 = tpu.reciprocal %88 {approx = true} : vector<2x8x1xf32> -> vector<2x8x1xf32>
    %90 = vector.broadcast %89 : vector<2x8x1xf32> to vector<2x8x8xf32>
    %91 = arith.mulf %86, %90 : vector<2x8x8xf32>
    "tpu.trace_start"() <{level = 10 : i32, message = "bqk,bkd->bqd"}> : () -> ()
    %cst_32 = arith.constant dense<0.000000e+00> : vector<2x8x8xf32>
    %92 = tpu.matmul %91, %77, %cst_32 {dimension_numbers = #tpu.dot_dimension_numbers<[2], [1], [1], [2], [0, 0, 0, 1, 1, 2], [0], [0]>} : vector<2x8x8xf32>, vector<2x8x8xf32>, vector<2x8x8xf32> -> vector<2x8x8xf32>
    "tpu.trace_stop"() : () -> ()
    %93 = vector.shape_cast %92 : vector<2x8x8xf32> to vector<16x8xf32>
    %94 = vector.extract_strided_slice %20 {offsets = [16, 0], sizes = [8, 32], strides = [1, 1]} : vector<32x32xf32> to vector<8x32xf32>
    %cst_33 = arith.constant dense<0.000000e+00> : vector<16x32xf32>
    %95 = tpu.matmul %93, %94, %cst_33 {dimension_numbers = #tpu.dot_dimension_numbers<[1], [0], [0], [1], [0, 0, 1, 1], [], []>} : vector<16x8xf32>, vector<8x32xf32>, vector<16x32xf32> -> vector<16x32xf32>
    %96 = arith.addf %71, %95 : vector<16x32xf32>
    %97 = vector.extract_strided_slice %10 {offsets = [0, 24], sizes = [16, 8], strides = [1, 1]} : vector<16x96xf32> to vector<16x8xf32>
    %98 = vector.shape_cast %97 : vector<16x8xf32> to vector<2x8x8xf32>
    %99 = vector.extract_strided_slice %10 {offsets = [0, 56], sizes = [16, 8], strides = [1, 1]} : vector<16x96xf32> to vector<16x8xf32>
    %100 = vector.shape_cast %99 : vector<16x8xf32> to vector<2x8x8xf32>
    %101 = vector.extract_strided_slice %10 {offsets = [0, 88], sizes = [16, 8], strides = [1, 1]} : vector<16x96xf32> to vector<16x8xf32>
    %102 = vector.shape_cast %101 : vector<16x8xf32> to vector<2x8x8xf32>
    "tpu.trace_start"() <{level = 10 : i32, message = "bqd,bkd->bqk"}> : () -> ()
    %cst_34 = arith.constant dense<0.000000e+00> : vector<2x8x8xf32>
    %103 = tpu.matmul %98, %100, %cst_34 {dimension_numbers = #tpu.dot_dimension_numbers<[2], [2], [1], [1], [0, 0, 0, 1, 1, 1], [0], [0]>} : vector<2x8x8xf32>, vector<2x8x8xf32>, vector<2x8x8xf32> -> vector<2x8x8xf32>
    "tpu.trace_stop"() : () -> ()
    %cst_35 = arith.constant 0.353553385 : f32
    %104 = vector.broadcast %cst_35 : f32 to vector<2x8x8xf32>
    %105 = arith.mulf %103, %104 : vector<2x8x8xf32>
    %106 = arith.addf %105, %18 : vector<2x8x8xf32>
    %cst_36 = arith.constant dense<0xFF800000> : vector<2x8xf32>
    %107 = vector.multi_reduction <maximumf>, %106, %cst_36 [2] : vector<2x8x8xf32> to vector<2x8xf32>
    %108 = vector.shape_cast %107 : vector<2x8xf32> to vector<2x8x1xf32>
    %109 = vector.broadcast %108 : vector<2x8x1xf32> to vector<2x8x8xf32>
    %110 = arith.subf %106, %109 : vector<2x8x8xf32>
    %111 = math.exp %110 : vector<2x8x8xf32>
    %cst_37 = arith.constant dense<0.000000e+00> : vector<2x8xf32>
    %112 = vector.multi_reduction <add>, %111, %cst_37 [2] : vector<2x8x8xf32> to vector<2x8xf32>
    %113 = vector.shape_cast %112 : vector<2x8xf32> to vector<2x8x1xf32>
    %114 = tpu.reciprocal %113 {approx = true} : vector<2x8x1xf32> -> vector<2x8x1xf32>
    %115 = vector.broadcast %114 : vector<2x8x1xf32> to vector<2x8x8xf32>
    %116 = arith.mulf %111, %115 : vector<2x8x8xf32>
    "tpu.trace_start"() <{level = 10 : i32, message = "bqk,bkd->bqd"}> : () -> ()
    %cst_38 = arith.constant dense<0.000000e+00> : vector<2x8x8xf32>
    %117 = tpu.matmul %116, %102, %cst_38 {dimension_numbers = #tpu.dot_dimension_numbers<[2], [1], [1], [2], [0, 0, 0, 1, 1, 2], [0], [0]>} : vector<2x8x8xf32>, vector<2x8x8xf32>, vector<2x8x8xf32> -> vector<2x8x8xf32>
    "tpu.trace_stop"() : () -> ()
    %118 = vector.shape_cast %117 : vector<2x8x8xf32> to vector<16x8xf32>
    %119 = vector.extract_strided_slice %20 {offsets = [24, 0], sizes = [8, 32], strides = [1, 1]} : vector<32x32xf32> to vector<8x32xf32>
    %cst_39 = arith.constant dense<0.000000e+00> : vector<16x32xf32>
    %120 = tpu.matmul %118, %119, %cst_39 {dimension_numbers = #tpu.dot_dimension_numbers<[1], [0], [0], [1], [0, 0, 1, 1], [], []>} : vector<16x8xf32>, vector<8x32xf32>, vector<16x32xf32> -> vector<16x32xf32>
    %121 = arith.addf %96, %120 : vector<16x32xf32>
    %c0_40 = arith.constant 0 : index
    %c0_41 = arith.constant 0 : index
    %c0_42 = arith.constant 0 : index
    %122 = vector.load %arg10[%c0_40, %c0_41, %c0_42] : memref<1x1x32xf32, #tpu.memory_space<vmem>>, vector<1x1x32xf32>
    %123 = vector.shape_cast %122 : vector<1x1x32xf32> to vector<1x32xf32>
    %124 = vector.broadcast %123 : vector<1x32xf32> to vector<16x32xf32>
    %125 = arith.addf %121, %124 : vector<16x32xf32>
    %126 = arith.addf %125, %3 : vector<16x32xf32>
    %c0_43 = arith.constant 0 : index
    %c0_44 = arith.constant 0 : index
    %c0_45 = arith.constant 0 : index
    %127 = vector.load %arg11[%c0_43, %c0_44, %c0_45] : memref<1x1x32xf32, #tpu.memory_space<vmem>>, vector<1x1x32xf32>
    %128 = vector.shape_cast %127 : vector<1x1x32xf32> to vector<1x32xf32>
    %c0_46 = arith.constant 0 : index
    %c0_47 = arith.constant 0 : index
    %c0_48 = arith.constant 0 : index
    %129 = vector.load %arg12[%c0_46, %c0_47, %c0_48] : memref<1x1x32xf32, #tpu.memory_space<vmem>>, vector<1x1x32xf32>
    %130 = vector.shape_cast %129 : vector<1x1x32xf32> to vector<1x32xf32>
    %cst_49 = arith.constant dense<0.000000e+00> : vector<16xf32>
    %131 = vector.multi_reduction <add>, %126, %cst_49 [1] : vector<16x32xf32> to vector<16xf32>
    %132 = vector.shape_cast %131 : vector<16xf32> to vector<16x1xf32>
    %cst_50 = arith.constant 3.200000e+01 : f32
    %133 = vector.broadcast %cst_50 : f32 to vector<16x1xf32>
    %134 = arith.divf %132, %133 : vector<16x1xf32>
    %135 = vector.broadcast %134 : vector<16x1xf32> to vector<16x32xf32>
    %136 = arith.subf %126, %135 : vector<16x32xf32>
    %137 = arith.mulf %136, %136 : vector<16x32xf32>
    %cst_51 = arith.constant dense<0.000000e+00> : vector<16xf32>
    %138 = vector.multi_reduction <add>, %137, %cst_51 [1] : vector<16x32xf32> to vector<16xf32>
    %139 = vector.shape_cast %138 : vector<16xf32> to vector<16x1xf32>
    %cst_52 = arith.constant 3.200000e+01 : f32
    %140 = vector.broadcast %cst_52 : f32 to vector<16x1xf32>
    %141 = arith.divf %139, %140 : vector<16x1xf32>
    %cst_53 = arith.constant 9.99999974E-6 : f32
    %142 = vector.broadcast %cst_53 : f32 to vector<16x1xf32>
    %143 = arith.addf %141, %142 : vector<16x1xf32>
    %144 = math.rsqrt %143 : vector<16x1xf32>
    %145 = vector.broadcast %144 : vector<16x1xf32> to vector<16x32xf32>
    %146 = arith.mulf %136, %145 : vector<16x32xf32>
    %147 = vector.broadcast %128 : vector<1x32xf32> to vector<16x32xf32>
    %148 = arith.mulf %146, %147 : vector<16x32xf32>
    %149 = vector.broadcast %130 : vector<1x32xf32> to vector<16x32xf32>
    %150 = arith.addf %148, %149 : vector<16x32xf32>
    %c0_54 = arith.constant 0 : index
    %c0_55 = arith.constant 0 : index
    %c0_56 = arith.constant 0 : index
    %151 = vector.load %arg13[%c0_54, %c0_55, %c0_56] : memref<1x32x64xf32, #tpu.memory_space<vmem>>, vector<1x32x64xf32>
    %152 = vector.shape_cast %151 : vector<1x32x64xf32> to vector<32x64xf32>
    %cst_57 = arith.constant dense<0.000000e+00> : vector<16x64xf32>
    %153 = tpu.matmul %150, %152, %cst_57 {dimension_numbers = #tpu.dot_dimension_numbers<[1], [0], [0], [1], [0, 0, 1, 1], [], []>} : vector<16x32xf32>, vector<32x64xf32>, vector<16x64xf32> -> vector<16x64xf32>
    %c0_58 = arith.constant 0 : index
    %c0_59 = arith.constant 0 : index
    %c0_60 = arith.constant 0 : index
    %154 = vector.load %arg14[%c0_58, %c0_59, %c0_60] : memref<1x1x64xf32, #tpu.memory_space<vmem>>, vector<1x1x64xf32>
    %155 = vector.shape_cast %154 : vector<1x1x64xf32> to vector<1x64xf32>
    %156 = vector.broadcast %155 : vector<1x64xf32> to vector<16x64xf32>
    %157 = arith.addf %153, %156 : vector<16x64xf32>
    %158 = arith.mulf %157, %157 : vector<16x64xf32>
    %159 = arith.mulf %157, %158 : vector<16x64xf32>
    %cst_61 = arith.constant 4.471500e-02 : f32
    %160 = vector.broadcast %cst_61 : f32 to vector<16x64xf32>
    %161 = arith.mulf %160, %159 : vector<16x64xf32>
    %162 = arith.addf %157, %161 : vector<16x64xf32>
    %cst_62 = arith.constant 0.797884583 : f32
    %163 = vector.broadcast %cst_62 : f32 to vector<16x64xf32>
    %164 = arith.mulf %163, %162 : vector<16x64xf32>
    %165 = math.tanh %164 : vector<16x64xf32>
    %cst_63 = arith.constant 1.000000e+00 : f32
    %166 = vector.broadcast %cst_63 : f32 to vector<16x64xf32>
    %167 = arith.addf %166, %165 : vector<16x64xf32>
    %cst_64 = arith.constant 5.000000e-01 : f32
    %168 = vector.broadcast %cst_64 : f32 to vector<16x64xf32>
    %169 = arith.mulf %168, %167 : vector<16x64xf32>
    %170 = arith.mulf %157, %169 : vector<16x64xf32>
    %c0_65 = arith.constant 0 : index
    %c0_66 = arith.constant 0 : index
    %c0_67 = arith.constant 0 : index
    %171 = vector.load %arg15[%c0_65, %c0_66, %c0_67] : memref<1x64x32xf32, #tpu.memory_space<vmem>>, vector<1x64x32xf32>
    %172 = vector.shape_cast %171 : vector<1x64x32xf32> to vector<64x32xf32>
    %cst_68 = arith.constant dense<0.000000e+00> : vector<16x32xf32>
    %173 = tpu.matmul %170, %172, %cst_68 {dimension_numbers = #tpu.dot_dimension_numbers<[1], [0], [0], [1], [0, 0, 1, 1], [], []>} : vector<16x64xf32>, vector<64x32xf32>, vector<16x32xf32> -> vector<16x32xf32>
    %c0_69 = arith.constant 0 : index
    %c0_70 = arith.constant 0 : index
    %c0_71 = arith.constant 0 : index
    %174 = vector.load %arg16[%c0_69, %c0_70, %c0_71] : memref<1x1x32xf32, #tpu.memory_space<vmem>>, vector<1x1x32xf32>
    %175 = vector.shape_cast %174 : vector<1x1x32xf32> to vector<1x32xf32>
    %176 = vector.broadcast %175 : vector<1x32xf32> to vector<16x32xf32>
    %177 = arith.addf %173, %176 : vector<16x32xf32>
    %178 = arith.addf %177, %150 : vector<16x32xf32>
    %c0_72 = arith.constant 0 : index
    %c0_73 = arith.constant 0 : index
    %c0_74 = arith.constant 0 : index
    %179 = vector.load %arg17[%c0_72, %c0_73, %c0_74] : memref<1x1x32xf32, #tpu.memory_space<vmem>>, vector<1x1x32xf32>
    %180 = vector.shape_cast %179 : vector<1x1x32xf32> to vector<1x32xf32>
    %c0_75 = arith.constant 0 : index
    %c0_76 = arith.constant 0 : index
    %c0_77 = arith.constant 0 : index
    %181 = vector.load %arg18[%c0_75, %c0_76, %c0_77] : memref<1x1x32xf32, #tpu.memory_space<vmem>>, vector<1x1x32xf32>
    %182 = vector.shape_cast %181 : vector<1x1x32xf32> to vector<1x32xf32>
    %cst_78 = arith.constant dense<0.000000e+00> : vector<16xf32>
    %183 = vector.multi_reduction <add>, %178, %cst_78 [1] : vector<16x32xf32> to vector<16xf32>
    %184 = vector.shape_cast %183 : vector<16xf32> to vector<16x1xf32>
    %cst_79 = arith.constant 3.200000e+01 : f32
    %185 = vector.broadcast %cst_79 : f32 to vector<16x1xf32>
    %186 = arith.divf %184, %185 : vector<16x1xf32>
    %187 = vector.broadcast %186 : vector<16x1xf32> to vector<16x32xf32>
    %188 = arith.subf %178, %187 : vector<16x32xf32>
    %189 = arith.mulf %188, %188 : vector<16x32xf32>
    %cst_80 = arith.constant dense<0.000000e+00> : vector<16xf32>
    %190 = vector.multi_reduction <add>, %189, %cst_80 [1] : vector<16x32xf32> to vector<16xf32>
    %191 = vector.shape_cast %190 : vector<16xf32> to vector<16x1xf32>
    %cst_81 = arith.constant 3.200000e+01 : f32
    %192 = vector.broadcast %cst_81 : f32 to vector<16x1xf32>
    %193 = arith.divf %191, %192 : vector<16x1xf32>
    %cst_82 = arith.constant 9.99999974E-6 : f32
    %194 = vector.broadcast %cst_82 : f32 to vector<16x1xf32>
    %195 = arith.addf %193, %194 : vector<16x1xf32>
    %196 = math.rsqrt %195 : vector<16x1xf32>
    %197 = vector.broadcast %196 : vector<16x1xf32> to vector<16x32xf32>
    %198 = arith.mulf %188, %197 : vector<16x32xf32>
    %199 = vector.broadcast %180 : vector<1x32xf32> to vector<16x32xf32>
    %200 = arith.mulf %198, %199 : vector<16x32xf32>
    %201 = vector.broadcast %182 : vector<1x32xf32> to vector<16x32xf32>
    %202 = arith.addf %200, %201 : vector<16x32xf32>
    %c0_83 = arith.constant 0 : index
    %c0_84 = arith.constant 0 : index
    %203 = vector.load %arg19[%c0_83, %c0_84] : memref<16x32xf32, #tpu.memory_space<vmem>>, vector<16x32xf32>
    tpu.vector_store %arg19[%c0_83, %c0_84], %202 {strides = array<i32>} : memref<16x32xf32, #tpu.memory_space<vmem>>, vector<16x32xf32>,
    return
  }
  func.func @transform_0(%arg0: i32) -> (i32, i32) {
    %c0_i32 = arith.constant 0 : i32
    %c0_i32_0 = arith.constant 0 : i32
    %c0_i32_1 = arith.constant 0 : i32
    return %c0_i32, %c0_i32_0 : i32, i32
  }
  func.func @transform_1(%arg0: i32) -> (i32, i32) {
    %c0_i32 = arith.constant 0 : i32
    %c0_i32_0 = arith.constant 0 : i32
    %c0_i32_1 = arith.constant 0 : i32
    return %c0_i32, %c0_i32_0 : i32, i32
  }
  func.func @transform_2(%arg0: i32) -> (i32, i32) {
    %c0_i32 = arith.constant 0 : i32
    %c0_i32_0 = arith.constant 0 : i32
    %c0_i32_1 = arith.constant 0 : i32
    return %c0_i32, %c0_i32_0 : i32, i32
  }
  func.func @transform_3(%arg0: i32) -> (i32, i32) {
    %c0_i32 = arith.constant 0 : i32
    %c0_i32_0 = arith.constant 0 : i32
    %c0_i32_1 = arith.constant 0 : i32
    return %c0_i32, %c0_i32_0 : i32, i32
  }
  func.func @transform_4(%arg0: i32) -> (i32, i32) {
    %c0_i32 = arith.constant 0 : i32
    %c0_i32_0 = arith.constant 0 : i32
    %c0_i32_1 = arith.constant 0 : i32
    return %c0_i32, %c0_i32_0 : i32, i32
  }
  func.func @transform_5(%arg0: i32) -> (i32, i32) {
    %c0_i32 = arith.constant 0 : i32
    %c0_i32_0 = arith.constant 0 : i32
    %c0_i32_1 = arith.constant 0 : i32
    return %c0_i32, %c0_i32_0 : i32, i32
  }
  func.func @transform_6(%arg0: i32) -> (i32, i32, i32) {
    %c0_i32 = arith.constant 0 : i32
    %c0_i32_0 = arith.constant 0 : i32
    %c0_i32_1 = arith.constant 0 : i32
    return %arg0, %c0_i32, %c0_i32_0 : i32, i32, i32
  }
  func.func @transform_7(%arg0: i32) -> (i32, i32, i32) {
    %c0_i32 = arith.constant 0 : i32
    %c0_i32_0 = arith.constant 0 : i32
    %c0_i32_1 = arith.constant 0 : i32
    return %arg0, %c0_i32, %c0_i32_0 : i32, i32, i32
  }
  func.func @transform_8(%arg0: i32) -> (i32, i32, i32) {
    %c0_i32 = arith.constant 0 : i32
    %c0_i32_0 = arith.constant 0 : i32
    %c0_i32_1 = arith.constant 0 : i32
    return %arg0, %c0_i32, %c0_i32_0 : i32, i32, i32
  }
  func.func @transform_9(%arg0: i32) -> (i32, i32, i32) {
    %c0_i32 = arith.constant 0 : i32
    %c0_i32_0 = arith.constant 0 : i32
    %c0_i32_1 = arith.constant 0 : i32
    return %arg0, %c0_i32, %c0_i32_0 : i32, i32, i32
  }
  func.func @transform_10(%arg0: i32) -> (i32, i32, i32) {
    %c0_i32 = arith.constant 0 : i32
    %c0_i32_0 = arith.constant 0 : i32
    %c0_i32_1 = arith.constant 0 : i32
    return %arg0, %c0_i32, %c0_i32_0 : i32, i32, i32
  }
  func.func @transform_11(%arg0: i32) -> (i32, i32, i32) {
    %c0_i32 = arith.constant 0 : i32
    %c0_i32_0 = arith.constant 0 : i32
    %c0_i32_1 = arith.constant 0 : i32
    return %arg0, %c0_i32, %c0_i32_0 : i32, i32, i32
  }
  func.func @transform_12(%arg0: i32) -> (i32, i32, i32) {
    %c0_i32 = arith.constant 0 : i32
    %c0_i32_0 = arith.constant 0 : i32
    %c0_i32_1 = arith.constant 0 : i32
    return %arg0, %c0_i32, %c0_i32_0 : i32, i32, i32
  }
  func.func @transform_13(%arg0: i32) -> (i32, i32, i32) {
    %c0_i32 = arith.constant 0 : i32
    %c0_i32_0 = arith.constant 0 : i32
    %c0_i32_1 = arith.constant 0 : i32
    return %arg0, %c0_i32, %c0_i32_0 : i32, i32, i32
  }
  func.func @transform_14(%arg0: i32) -> (i32, i32, i32) {
    %c0_i32 = arith.constant 0 : i32
    %c0_i32_0 = arith.constant 0 : i32
    %c0_i32_1 = arith.constant 0 : i32
    return %arg0, %c0_i32, %c0_i32_0 : i32, i32, i32
  }
  func.func @transform_15(%arg0: i32) -> (i32, i32, i32) {
    %c0_i32 = arith.constant 0 : i32
    %c0_i32_0 = arith.constant 0 : i32
    %c0_i32_1 = arith.constant 0 : i32
    return %arg0, %c0_i32, %c0_i32_0 : i32, i32, i32
  }
  func.func @transform_16(%arg0: i32) -> (i32, i32, i32) {
    %c0_i32 = arith.constant 0 : i32
    %c0_i32_0 = arith.constant 0 : i32
    %c0_i32_1 = arith.constant 0 : i32
    return %arg0, %c0_i32, %c0_i32_0 : i32, i32, i32
  }
  func.func @transform_17(%arg0: i32) -> (i32, i32, i32) {
    %c0_i32 = arith.constant 0 : i32
    %c0_i32_0 = arith.constant 0 : i32
    %c0_i32_1 = arith.constant 0 : i32
    return %arg0, %c0_i32, %c0_i32_0 : i32, i32, i32
  }
  func.func @transform_18(%arg0: i32) -> (i32, i32) {
    %c0_i32 = arith.constant 0 : i32
    %c0_i32_0 = arith.constant 0 : i32
    %c0_i32_1 = arith.constant 0 : i32
    return %c0_i32, %c0_i32_0 : i32, i32
  }
}

</mosaic_0001>

<bundles_post_ra>
// kernel: tpu_custom_call.1
= control target key start
LH: loop header
LB: loop body
LE: loop exit
PB: predicated region body
PF: predicated region fallthrough
CT: control target
= control target key end

     0   :  { %s4364_s0 = inlined_call_operand.hbm [shape: f32[2,8], index: 0, kind: input, shape index: {}]   ;;  %s4365_s1 = inlined_call_operand.hbm [shape: f32[16,32], index: 1, kind: input, shape index: {}]   ;;  %s4366_s2 = inlined_call_operand.hbm [shape: f32[16,32], index: 2, kind: input, shape index: {}]   ;;  %s4367_s3 = inlined_call_operand.vmem [shape: f32[1,32], index: 3, kind: input, shape index: {}]   ;;  %s4368_s4 = inlined_call_operand.hbm [shape: f32[1,32], index: 4, kind: input, shape index: {}]   ;;  %s4369_s5 = inlined_call_operand.vmem [shape: f32[1,32], index: 5, kind: input, shape index: {}]   ;;  %s4370_s6 = inlined_call_operand.vmem [shape: f32[2,32,96], index: 6, kind: input, shape index: {}]   ;;  %s4371_s7 = inlined_call_operand.vmem [shape: f32[2,1,96], index: 7, kind: input, shape index: {}]   ;;  %s4372_s8 = inlined_call_operand.vmem [shape: f32[2,32,32], index: 8, kind: input, shape index: {}]   ;;  %s4373_s9 = inlined_call_operand.vmem [shape: f32[2,1,32], index: 9, kind: input, shape index: {}]   ;;  %s4374_s10 = inlined_call_operand.vmem [shape: f32[2,1,32], index: 10, kind: input, shape index: {}]   ;;  %s4375_s11 = inlined_call_operand.vmem [shape: f32[2,1,32], index: 11, kind: input, shape index: {}]   ;;  %s4376_s12 = inlined_call_operand.vmem [shape: f32[2,32,64], index: 12, kind: input, shape index: {}]   ;;  %s4377_s13 = inlined_call_operand.vmem [shape: f32[2,1,64], index: 13, kind: input, shape index: {}]   ;;  %s4378_s14 = inlined_call_operand.vmem [shape: f32[2,64,32], index: 14, kind: input, shape index: {}]   ;;  %s4379_s15 = inlined_call_operand.vmem [shape: f32[2,1,32], index: 15, kind: input, shape index: {}]   ;;  %s4380_s16 = inlined_call_operand.vmem [shape: f32[2,1,32], index: 16, kind: input, shape index: {}]   ;;  %s4381_s17 = inlined_call_operand.vmem [shape: f32[2,1,32], index: 17, kind: input, shape index: {}]   ;;  %s4382_s18 = inlined_call_operand.hbm [shape: f32[16,32], index: 18, kind: output, shape index: {}]  }
   0x1   :  { %4392 = sst [smem:[#allocation16_spill]] %s4364_s0 }
   0x2   :  { %4393 = sst [smem:[#allocation17_spill]] %s4365_s1 }
   0x3   :  { %4394 = sst [smem:[#allocation18_spill]] %s4366_s2 }
   0x4   :  { %4395 = sst [smem:[#allocation19_spill]] %s4367_s3 }
   0x5   :  { %4396 = sst [smem:[#allocation20_spill]] %s4368_s4 }
   0x6   :  { %4397 = sst [smem:[#allocation21_spill]] %s4369_s5 }
   0x7   :  { %4398 = sst [smem:[#allocation22_spill]] %s4370_s6 }
   0x8   :  { %4399 = sst [smem:[#allocation23_spill]] %s4372_s8 }
   0x9   :  { %4400 = sst [smem:[#allocation24_spill]] %s4376_s12 }
   0xa   :  { %4401 = sst [smem:[#allocation25_spill]] %s4379_s15 }
   0xb   :  { %4402 = sst [smem:[#allocation26_spill]] %s4380_s16 }
   0xc   :  { %4403 = sst [smem:[#allocation27_spill]] %s4381_s17 }
   0xd   :  { %4404 = sst [smem:[#allocation28_spill]] %s4382_s18 }
   0xe   :  { %23 = vsyncpa [#allocation3], 0 }
   0xf   :  { %24 = vsyncpa [#allocation6], 0 }
  0x10   :  { %25 = vsyncpa [#allocation9], 0 }
  0x11   :  { %26 = vsyncpa [#allocation4], 0  ;;  %s3888_s27 = smov 0  }
  0x12 LB: > { %4405 = sst [smem:[#allocation15_spill]] %s3768_s27  ;;  %s3770_s28 = smov [#allocation5]   ;;  %s3768_s27 = sphi %s3888_s27, %s32_s27  }
  0x13   : > { %s519_s29 = sshll.u32 %s3770_s28, 4  ;;  %s3894_s30 = sadd.s32 4294967295, %s3768_s27   ;;  %s3900_s29 = int_to_ptr.vmem [resolvable:$true] %s519_s29 }
  0x14   : > { %p3164_p0 = scmp.ge.s32.totalorder %s3768_s27, 1  ;;  %p496_p1 = scmp.lt.s32.totalorder %s3768_s27, 3 }
  0x15   : > { %p4388_p3 = scmp.eq.s32.totalorder %s3894_s30, 0  ;;  %s3771_s19 = smov [#allocation2]  }
  0x16   : > { %p3902_p4 = pnand %p3164_p0, %p496_p1  ;;  %s509_s1 = sshll.u32 %s3771_s19, 4  ;;  %s3908_s1 = int_to_ptr.vmem [resolvable:$true] %s509_s1 }
  0x17   : > { %s3772_s21 = smov [#allocation7]   ;;  %s3773_s2 = smov [#allocation8]  }
  0x18   : > { %s4406_s0 = scalar_select %p3902_p4, 1, 0 }
  0x19   : > { %p3506_p5 = pneg %p3902_p4  ;;  %s532_s22 = sshll.u32 %s3772_s21, 4  ;;  %s3916_s22 = int_to_ptr.vmem [resolvable:$true] %s532_s22 }
  0x1a   : > { %s3918_s23 = sshll.u32 %s3773_s2, 4  ;;  %s4408_s26 = sld [smem:[#allocation17_spill]]  ;;  %s550_s23 = int_to_ptr.vmem [resolvable:$true] %s3918_s23 }
  0x1b   : > { %p3912_p6 = pnand %p4388_p3, %p3506_p5 }
  0x1d   : > { %p3928_p8 = pneg %p3912_p6 }
  0x20   : > { %s3608_s28 = scalar_lea.hbm %s4408_s26, 256 }
  0x21   : > { %p3609_p7 = scmp.ne.s32.totalorder %s4408_s26, %s3608_s28  ;;  %p3615_p11 = scmp.lt.u32.totalorder %s3608_s28, %s4408_s26 }
  0x23   : > { %p3611_p9 = pnand %p3928_p8, %p3609_p7 }
  0x25   : > { %p3612_p10 = pneg %p3611_p9 }
  0x27   : > { %p3617_p12 = pnand %p3615_p11, %p3612_p10 }
  0x29   : > { %3620 = shalt.err (!%p3617_p12)
}
  0x2a   : > { %s3621_s27 = scalar_lea.vmem %s3900_s29, 256  ;;  %p3629_p5 = scmp.lt.s32.totalorder %s3900_s29, %s3900_s29 }
  0x2b   : > { %p3622_p13 = scmp.ne.s32.totalorder %s3900_s29, %s3621_s27  ;;  %p3630_p2 = scmp.lt.s32.totalorder %s3621_s27, %s3621_s27 }
  0x2d   : > { %p3624_p0 = pnand %p3622_p13, %p3928_p8  ;;  %p3631_p7 = por %p3630_p2, %p3629_p5 }
  0x2f   : > { %p3625_p1 = pneg %p3624_p0 }
  0x31   : > { %p3632_p9 = pnand %p3631_p7, %p3625_p1 }
  0x33   : > { %3635 = shalt.err (!%p3632_p9)
}
  0x34   : > { %s3774_s24 = smov 128   ;;  %s3775_s25 = smov 8  }
  0x35   : > { %3512 = dma.hbm_to_vmem [thread:$0]  (!%p3912_p6), %s4408_s26, 256, %s3900_s29, [#allocation6], %s3774_s24, %s3774_s24, %s3775_s25  }
  0x36   : > { %s4410_s5 = sld [smem:[#allocation16_spill]] }
  0x3c   : > { %s3636_s27 = scalar_lea.hbm %s4410_s5, 32 }
  0x3d   : > { %p3637_p2 = scmp.ne.s32.totalorder %s4410_s5, %s3636_s27  ;;  %p3643_p12 = scmp.lt.u32.totalorder %s3636_s27, %s4410_s5 }
  0x3f   : > { %p3639_p10 = pnand %p3637_p2, %p3928_p8 }
  0x41   : > { %p3640_p11 = pneg %p3639_p10 }
  0x43   : > { %p3645_p13 = pnand %p3643_p12, %p3640_p11 }
  0x45   : > { %3648 = shalt.err (!%p3645_p13)
}
  0x46   : > { %s3649_s29 = scalar_lea.vmem %s3908_s1, 32  ;;  %p3657_p7 = scmp.lt.s32.totalorder %s3908_s1, %s3908_s1 }
  0x47   : > { %p3650_p0 = scmp.ne.s32.totalorder %s3908_s1, %s3649_s29  ;;  %p3658_p9 = scmp.lt.s32.totalorder %s3649_s29, %s3649_s29 }
  0x49   : > { %p3652_p1 = pnand %p3650_p0, %p3928_p8  ;;  %p3659_p2 = por %p3658_p9, %p3657_p7 }
  0x4b   : > { %p3653_p5 = pneg %p3652_p1 }
  0x4d   : > { %p3660_p10 = pnand %p3659_p2, %p3653_p5 }
  0x4f   : > { %3663 = shalt.err (!%p3660_p10)
}
  0x50   : > { %3509 = dma.hbm_to_vmem [thread:$0]  (!%p3912_p6), %s4410_s5, 32, %s3908_s1, [#allocation3]  }
  0x51   : > { %s4411_s28 = sld [smem:[#allocation18_spill]] }
  0x57   : > { %s3664_s19 = scalar_lea.hbm %s4411_s28, 256 }
  0x58   : > { %p3665_p11 = scmp.ne.s32.totalorder %s4411_s28, %s3664_s19  ;;  %p3671_p0 = scmp.lt.u32.totalorder %s3664_s19, %s4411_s28 }
  0x5a   : > { %p3667_p12 = pnand %p3665_p11, %p3928_p8 }
  0x5c   : > { %p3668_p13 = pneg %p3667_p12 }
  0x5e   : > { %p3673_p1 = pnand %p3671_p0, %p3668_p13 }
  0x60   : > { %3676 = shalt.err (!%p3673_p1)
}
  0x61   : > { %s3677_s1 = scalar_lea.vmem %s3916_s22, 256  ;;  %p3685_p2 = scmp.lt.s32.totalorder %s3916_s22, %s3916_s22 }
  0x62   : > { %p3678_p5 = scmp.ne.s32.totalorder %s3916_s22, %s3677_s1  ;;  %p3686_p10 = scmp.lt.s32.totalorder %s3677_s1, %s3677_s1 }
  0x64   : > { %p3680_p7 = pnand %p3678_p5, %p3928_p8  ;;  %p3687_p11 = por %p3686_p10, %p3685_p2 }
  0x66   : > { %p3681_p9 = pneg %p3680_p7 }
  0x68   : > { %p3688_p12 = pnand %p3687_p11, %p3681_p9 }
  0x6a   : > { %3691 = shalt.err (!%p3688_p12)
}
  0x6b   : > { %3515 = dma.hbm_to_vmem [thread:$0]  (!%p3912_p6), %s4411_s28, 256, %s3916_s22, [#allocation6], %s3774_s24, %s3774_s24, %s3775_s25  }
  0x6c   : > { %s4412_s4 = sld [smem:[#allocation20_spill]] }
  0x72   : > { %s3692_s19 = scalar_lea.hbm %s4412_s4, 16 }
  0x73   : > { %p3693_p13 = scmp.ne.s32.totalorder %s4412_s4, %s3692_s19  ;;  %p3699_p5 = scmp.lt.u32.totalorder %s3692_s19, %s4412_s4 }
  0x75   : > { %p3695_p0 = pnand %p3693_p13, %p3928_p8 }
  0x77   : > { %p3696_p1 = pneg %p3695_p0 }
  0x79   : > { %p3701_p7 = pnand %p3699_p5, %p3696_p1 }
  0x7b   : > { %3704 = shalt.err (!%p3701_p7)
}
  0x7c   : > { %s3705_s1 = scalar_lea.vmem %s550_s23, 16  ;;  %s3712_s22 = scalar_lea.vmem %s550_s23, 32 }
  0x7d   : > { %p3706_p9 = scmp.ne.s32.totalorder %s550_s23, %s3705_s1  ;;  %p3713_p11 = scmp.lt.s32.totalorder %s550_s23, %s550_s23 }
  0x7e   : > { %p3714_p12 = scmp.lt.s32.totalorder %s3712_s22, %s3705_s1 }
  0x7f   : > { %p3708_p2 = pnand %p3706_p9, %p3928_p8 }
  0x80   : > { %p3715_p3 = por %p3714_p12, %p3713_p11 }
  0x81   : > { %p3709_p10 = pneg %p3708_p2 }
  0x83   : > { %p3716_p4 = pnand %p3715_p3, %p3709_p10 }
  0x85   : > { %3719 = shalt.err (!%p3716_p4)
}
  0x86   : > { %3518 = dma.hbm_to_vmem [thread:$0]  (!%p3912_p6), %s4412_s4, 16, %s550_s23, [#allocation9]  }
  0x87   : > { %p4413_p13 = scmp.ne.s32.totalorder %s4406_s0, 0 }
  0x88   : > { %p4414_p0 = scmp.eq.s32.totalorder (!%p4413_p13), %s3894_s30, 0 }
  0x89   : > { %645 = sbr.rel (%p4413_p13) target bundleno = 4717 (0x126d), region = 92 }
  0x90   : > { %3751 = dma.done.wait (%p4414_p0), [#allocation3], 32   ;;  %p4415_p8 = pmov %p4414_p0 }
  0x91   : > { %p4416_p1 = pmov %p4414_p0 }
  0x92   : > { %3753 = vsyncadd (%p4415_p8), [#allocation3], 4294967264 }
  0x93   : > { %3755 = dma.done.wait (%p4416_p1), [#allocation6], 512   ;;  %p4417_p3 = pmov %p4414_p0 }
  0x94   : > { %p4418_p4 = pmov %p4414_p0 }
  0x95   : > { %3757 = vsyncadd (%p4417_p3), [#allocation6], 4294966784 }
  0x96   : > { %3759 = dma.done.wait (%p4418_p4), [#allocation9], 16   ;;  %p4419_p6 = pmov %p4414_p0 }
  0x97   : > { %p745_p5 = scmp.lt.s32.totalorder %s3894_s30, 1  ;;  %s4420_s6 = sld [smem:[#allocation22_spill]] }
  0x98   : > { %3761 = vsyncadd (%p4419_p6), [#allocation9], 4294967280  ;;  %s4421_s8 = sld [smem:[#allocation23_spill]]  ;;  %s4422_s12 = sld [smem:[#allocation24_spill]] }
  0x99   : > { %s4036_s18 = scalar_select %p745_p5, %s3894_s30, 1 }
  0x9a   : > { %s4423_s25 = sld [smem:[#allocation25_spill]]  ;;  %p4426_p7 = scmp.ne.s32.totalorder %s3894_s30, 0 }
  0x9b   : > { %s3237_s0 = sshll.u32 %s4036_s18, 5  ;;  %s774_s5 = scalar_lea.vmem %s4377_s13, %s4036_s18  ;;  %v793_v0 = vld [vmem:[#allocation5] sm:$0xff] (!%p4426_p7)  ;;  %v795_v1 = vld [vmem:[#allocation7] sm:$0xff] (!%p4426_p7)  ;;  %v794_v4 = vld [vmem:[#allocation5 + $0x8] sm:$0xff] (!%p4426_p7)  ;;  %vm810_vm0 = vcmask (!%p4426_p7), 261120  }
  0x9c   : > { %s4427_s21 = sld [smem:[#allocation19_spill]] (!%p4426_p7)  ;;  %v797_v3 = vadd.f32 (!%p4426_p7), %v795_v1, %v793_v0  ;;  %v796_v5 = vld [vmem:[#allocation7 + $0x8] sm:$0xff] (!%p4426_p7)  ;;  %v3185_v28 = vld [vmem:[#allocation8] ss:$0 sm:$0xff] (!%p4426_p7)  ;;  %s4428_s3 = sld [smem:[#allocation21_spill]] (!%p4426_p7) }
  0x9d   : > { %s4046_s17 = scalar_lea.vmem %s4420_s6, %s3237_s0  ;;  %s3240_s6 = sshll.u32 %s4036_s18, 6  ;;  %v798_v6 = vadd.f32 (!%p4426_p7), %v796_v5, %v794_v4 }
  0x9e   : > { %s4051_s2 = scalar_lea.vmem %s4421_s8, %s3237_s0  ;;  %s4068_s4 = scalar_lea.vmem %s4422_s12, %s3237_s0 }
  0x9f   : > { %s4078_s1 = scalar_lea.vmem %s4378_s14, %s3240_s6  ;;  %s4424_s8 = sld [smem:[#allocation26_spill]] }
  0xa0   : > { %s782_s20 = scalar_lea.vmem %s4423_s25, %s4036_s18  ;;  %s4425_s12 = sld [smem:[#allocation27_spill]] }
  0xa1   : > { %792 = sbr.rel (%p4426_p7) target bundleno = 483 (0x1e3), region = 112 }
  0xa2   : > { %v3184_v2 = vld [vmem:[%s4427_s21] ss:$0 sm:$0xff] (!%p4426_p7) }
  0xa3   : > { %v806_v7 = vadd.f32 (!%p4426_p7), %v3184_v2, %v797_v3  ;;  %v807_v8 = vadd.f32 (!%p4426_p7), %v3184_v2, %v798_v6  ;;  %v3186_v30 = vld [vmem:[%s4428_s3] ss:$0 sm:$0xff] (!%p4426_p7) }
  0xa5   : > { %s785_s15 = scalar_lea.vmem %s4424_s8, %s4036_s18  ;;  %v811_v9 = vsel (!%p4426_p7), %vm810_vm0, %v806_v7, 0.0  ;;  %v814_v10 = vsel (!%p4426_p7), %vm810_vm0, %v807_v8, 0.0 }
  0xa6   : > { %s788_s26 = scalar_lea.vmem %s4425_s12, %s4036_s18  ;;  %812 = vadd.xlane.f32.xlu0 (!%p4426_p7), %v811_v9 }
  0xaa   : > { %815 = vadd.xlane.f32.xlu0 %v814_v10 }
 0x133   : > { %v813_v11 = vpop.xlane.xlu0 %812 }
 0x134   : > { %v818_v12 = vmul.f32 0.03125, %v813_v11 }
 0x136   : > { %v820_v13 = vsub.f32 %v806_v7, %v818_v12 }
 0x137   : > { %v816_v14 = vpop.xlane.xlu0 %815 }
 0x138   : > { %v819_v15 = vmul.f32 0.03125, %v816_v14  ;;  %v822_v16 = vmul.f32 %v820_v13, %v820_v13 }
 0x13a   : > { %v821_v17 = vsub.f32 %v807_v8, %v819_v15  ;;  %v824_v18 = vsel %vm810_vm0, %v822_v16, 0.0 }
 0x13b   : > { %825 = vadd.xlane.f32.xlu1 %v824_v18 }
 0x13c   : > { %v823_v19 = vmul.f32 %v821_v17, %v821_v17 }
 0x13e   : > { %v827_v20 = vsel %vm810_vm0, %v823_v19, 0.0 }
 0x13f   : > { %828 = vadd.xlane.f32.xlu1 %v827_v20 }
 0x1c8   : > { %v826_v21 = vpop.xlane.xlu1 %825 }
 0x1c9   : > { %v830_v22 = vmul.f32 0.03125, %v826_v21 }
 0x1cb   : > { %v832_v23 = vadd.f32 1e-05, %v830_v22 }
 0x1cc   : > { %v829_v24 = vpop.xlane.xlu1 %828 }
 0x1cd   : > { %3560 = vrsqrt.f32 %v832_v23  ;;  %v831_v25 = vmul.f32 0.03125, %v829_v24 }
 0x1cf   : > { %v833_v26 = vadd.f32 1e-05, %v831_v25 }
 0x1d1   : > { %3562 = vrsqrt.f32 %v833_v26 }
 0x1d7   : > { %v3561_v27 = vpop.eup %3560 }
 0x1d8   : > { %v836_v29 = vmul.f32 %v3561_v27, %v820_v13 }
 0x1da   : > { %v844_v31 = vmul.f32 %v3185_v28, %v836_v29 }
 0x1db   : > { %v3563_v32 = vpop.eup %3562 }
 0x1dc   : > { %v852_v33 = vadd.f32 %v3186_v30, %v844_v31  ;;  %v837_v34 = vmul.f32 %v3563_v32, %v821_v17 }
 0x1de   : > { %854 = vst.msk [vmem:[#allocation10] sm:$0xff] %vm810_vm0, %v852_v33  ;;  %v845_v35 = vmul.f32 %v3185_v28, %v837_v34 }
 0x1e0   : > { %v853_v36 = vadd.f32 %v3186_v30, %v845_v35 }
 0x1e2   : > { %855 = vst.msk [vmem:[#allocation10 + $0x8] sm:$0xff] %vm810_vm0, %v853_v36 }
 0x1e3 PF: > { %v858_v37 = vld [vmem:[%s4046_s17] sm:$0xff]  ;;  %v859_v38 = vld [vmem:[%s4046_s17 + $0x8] sm:$0xff]  ;;  %v860_v39 = vld [vmem:[%s4046_s17 + $0x10] sm:$0xff]  ;;  %vm869_vm1 = vcmask 261120   ;;  %v3776_v45 = vmov 0.0   ;;  %vm3777_vm2 = vmmov 0   ;;  %s4429_s27 = scalar_lea.vmem %s4371_s7, %s4036_s18  ;;  %v957_v56 = vlaneseq }
 0x1e4   : > { %v3448_v40 = vpack.c.bf16 %v859_v38, %v858_v37  ;;  %v861_v41 = vld [vmem:[%s4046_s17 + $0x18] sm:$0xff]  ;;  %3328 = vmatprep.subr.mxu0 %v3776_v45  ;;  %3330 = vmatprep.mubr.msk.f32.mxu0 %vm3777_vm2, %v3776_v45  ;;  %v3187_v46 = vld [vmem:[%s4429_s27] ss:$0 sm:$0xff]  ;;  %s3778_s29 = smov 96   ;;  %s3779_s22 = smov 64   ;;  %vm995_vm3 = vcmask 64512  }
 0x1e5   : > { %v4110_v42 = vld [vmem:[#allocation10] sm:$0xff]  ;;  %v3452_v43 = vpack.c.bf16 %v861_v41, %v860_v39  ;;  %s3780_s24 = smov 120   ;;  %v3781_v54 = vmov 1966171168   ;;  %v958_v58 = vshrl.u32 %v957_v56, 7  ;;  %s3782_s23 = smov 88  }
 0x1e6   : > { %3315 = vmatprep.mubr.msk.f32.mxu1 %vm869_vm1, %v4110_v42  ;;  %3449 = vmatprep.subr.bf16.mxu1 %v3448_v40  ;;  %v955_v55 = vunpack.c.l.s4 %v3781_v54  ;;  %v951_v59 = vld [vmem:[#allocation2] sm:$0x3]  ;;  %s3783_s0 = smov 80   ;;  %s3784_s16 = smov 56   ;;  %vm2836_vm4 = vcmask 523264  }
 0x1e7   : > { %3451 = vmatpush3.bf16.msra.mxu1 %v3448_v40  ;;  %v952_v60 = vsub.f32 1.0, %v951_v59  ;;  %v978_v0 = vsub.s32 0, %v958_v58  ;;  %s3785_s19 = smov 112   ;;  %s3786_s6 = smov 48  }
 0x1e8   : > { %3453 = vmatprep.subr.bf16.mxu1 %v3452_v43  ;;  %v956_v57 = vunpack.c.0.s8 %v955_v55  ;;  %s3787_s21 = smov 72   ;;  %s3788_s8 = smov 104  }
 0x1e9   : > { %v4114_v44 = vld [vmem:[#allocation10 + $0x8] sm:$0xff]  ;;  %s3789_s12 = smov 40   ;;  %s3790_s3 = smov [#allocation10]  }
 0x1ea   : > { %v959_v61 = vsub.s32 %v956_v57, %v958_v58  ;;  %s2972_s17 = sshll.u32 %s3790_s3, 4  ;;  %p3527_p9 = scmp.eq.s32.totalorder %s3894_s30, 1  ;;  %s2973_s17 = int_to_ptr.vmem [resolvable:$true] %s2972_s17 }
 0x1eb   : > { %3455 = vmatpush3.bf16.msra.mxu1 %v3452_v43  ;;  %p3727_p12 = scmp.lt.s32.totalorder %s2973_s17, %s2973_s17 }
 0x1ec   : > { %3318 = vmatprep.subr.mxu1 %v3776_v45  ;;  %v960_v62 = vrot.slane %v952_v60, %v959_v61 }
 0x1ee   : > { %3316 = vmatmul.mubr.msk.f32.vlgmr.msra.gmra.mrb[0].mxu1 %vm869_vm1, %v4114_v44  ;;  %v968_v63 = vrot.slane %v960_v62, %v959_v61  ;;  %v961_v1 = vcombine.high %v960_v62, %v960_v62 }
 0x1ef   : > { %3320 = vmatprep.mubr.msk.f32.mxu1 %vm3777_vm2, %v3776_v45 }
 0x1f0   : > { %v979_v2 = vrot.slane %v968_v63, %v978_v0  ;;  %v975_v3 = vrot.slane %v961_v1, %v959_v61 }
 0x1f2   : > { %v4152_v4 = vmul.f32 -1e+09, %v979_v2  ;;  %v983_v5 = vrot.slane %v975_v3, %v978_v0 }
 0x1f4   : > { %v4155_v10 = vmul.f32 -1e+09, %v983_v5 }
 0x2c1   : > { %v3317_v47 = vpop.f32.mrb[0].mxu1 }
 0x2c2   : > { %v942_v48 = vpop.f32.mrb[1].mxu1  ;;  %v4132_v50 = vadd.f32 %v3317_v47, %v3187_v46 }
 0x2c3   : > { %v4129_v49 = vadd.f32 %v3187_v46, %v942_v48 }
 0x2c5   : > { %993 = vrot.lane.b32.xlu0 %v4129_v49, %s3778_s29 }
 0x2c9   : > { %1071 = vrot.lane.b32.xlu0 %v4132_v50, %s3778_s29 }
 0x2cd   : > { %1249 = vrot.lane.b32.xlu0 %v4132_v50, %s3779_s22 }
 0x2d1   : > { %1403 = vrot.lane.b32.xlu0 %v4132_v50, %s3780_s24 }
 0x337   : > { %v994_v51 = vpop.permute.xlu0 %993 }
 0x338   : > { %3319 = vmatpush3.xpose.msk.msra.mxu1 %vm995_vm3, %v994_v51 }
 0x339   : > { %3323 = vmatprep.subr.mxu1 %v3776_v45 }
 0x33b   : > { %3321 = vmatmul.mubr.msk.f32.vlgmr.msra.gmra.mrb[2].mxu1 %vm995_vm3, %v4129_v49  ;;  %v1072_v52 = vpop.permute.xlu0 %1071 }
 0x33c   : > { %3324 = vmatpush3.xpose.msk.msra.mxu1 %vm995_vm3, %v1072_v52  ;;  %3325 = vmatprep.mubr.msk.f32.mxu1 %vm3777_vm2, %v3776_v45 }
 0x33d   : > { %3333 = vmatprep.subr.mxu1 %v3776_v45 }
 0x33f   : > { %3326 = vmatmul.mubr.msk.f32.vlgmr.msra.gmra.mrb[4].mxu1 %vm995_vm3, %v4132_v50  ;;  %v1250_v53 = vpop.permute.xlu0 %1249 }
 0x340   : > { %3334 = vmatpush3.msra.mxu1 %v1250_v53  ;;  %3335 = vmatprep.mubr.msk.f32.mxu1 %vm3777_vm2, %v3776_v45 }
 0x341   : > { %3343 = vmatprep.subr.mxu1 %v3776_v45 }
 0x343   : > { %v1404_v17 = vpop.permute.xlu0 %1403 }
 0x40e   : > { %v1066_v6 = vpop.f32.mrb[2].mxu1 }
 0x40f   : > { %v1147_v7 = vmul.f32 0.35355338, %v1066_v6  ;;  %v3322_v8 = vpop.f32.mrb[3].mxu1 }
 0x411   : > { %v1149_v9 = vadd.f32 %v1147_v7, %v4152_v4 }
 0x412   : > { %v1143_v11 = vpop.f32.mrb[4].mxu1 }
 0x413   : > { %v1148_v12 = vmul.f32 0.35355338, %v1143_v11  ;;  %v3327_v13 = vpop.f32.mrb[5].mxu1  ;;  %v1151_v14 = vsel %vm995_vm3, %v1149_v9, -inf }
 0x414   : > { %1152 = vmax.xlane.f32.xlu0 %v1151_v14 }
 0x415   : > { %v1150_v15 = vadd.f32 %v1148_v12, %v4155_v10 }
 0x417   : > { %v1154_v16 = vsel %vm995_vm3, %v1150_v15, -inf }
 0x418   : > { %1155 = vmax.xlane.f32.xlu1 %v1154_v16 }
 0x42a   : > { %1173 = vrot.lane.b32.xlu0 %v4129_v49, %s3779_s22 }
 0x42e   : > { %1325 = vrot.lane.b32.xlu0 %v4129_v49, %s3780_s24  ;;  %s4432_s24 = scalar_lea.vmem %s4375_s11, %s4036_s18 }
 0x4a1   : > { %v1153_v18 = vpop.xlane.xlu0 %1152 }
 0x4a2   : > { %v1157_v25 = vsub.f32 %v1149_v9, %v1153_v18  ;;  %v988_v18 = vld [vmem:[%s4051_s2] sm:$0xff] }
 0x4a4   : > { %v1159_v26 = vmul.f32 1.442695, %v1157_v25 }
 0x4a5   : > { %v1156_v19 = vpop.xlane.xlu1 %1155  ;;  %v1174_v20 = vpop.permute.xlu0 %1173 }
 0x4a6   : > { %v1158_v21 = vsub.f32 %v1150_v15, %v1156_v19  ;;  %3329 = vmatpush3.msra.mxu0 %v1174_v20 }
 0x4a7   : > { %3338 = vmatprep.subr.mxu0 %v3776_v45 }
 0x4a8   : > { %v1161_v22 = vmul.f32 1.442695, %v1158_v21 }
 0x4a9   : > { %v1326_v37 = vpop.permute.xlu0 %1325 }
 0x4aa   : > { %3564 = vpow2.f32 %v1161_v22 }
 0x4ab   : > { %3566 = vpow2.f32 %v1159_v26 }
 0x4b4   : > { %v3565_v23 = vpop.eup %3564 }
 0x4b5   : > { %v1166_v24 = vsel %vm995_vm3, %v3565_v23, 0.0  ;;  %v3567_v27 = vpop.eup %3566 }
 0x4b6   : > { %1167 = vadd.xlane.f32.xlu1 %v1166_v24  ;;  %v1163_v28 = vsel %vm995_vm3, %v3567_v27, 0.0 }
 0x4c7   : > { %1405 = vrot.lane.b32.xlu1 %v4132_v50, %s3782_s23 }
 0x4eb   : > { %1164 = vadd.xlane.f32.xlu1 %v1163_v28 }
 0x4fc   : > { %1327 = vrot.lane.b32.xlu1 %v4129_v49, %s3782_s23 }
 0x500   : > { %1823 = vrot.lane.b32.xlu1 %v4129_v49, %s3783_s0 }
 0x543   : > { %v1168_v29 = vpop.xlane.xlu1 %1167 }
 0x544   : > { %3568 = vrcp.f32 %v1168_v29 }
 0x547   : > { %v1406_v32 = vpop.permute.xlu1 %1405 }
 0x54e   : > { %v3569_v30 = vpop.eup %3568 }
 0x54f   : > { %v1172_v31 = vmul.f32 %v3569_v30, %v3565_v23 }
 0x551   : > { %3336 = vmatmul.mubr.msk.f32.vlgmr.msra.gmra.mrb[6].mxu1 %vm995_vm3, %v1172_v31 }
 0x552   : > { %3344 = vmatpush3.xpose.msk.msra.mxu1 %vm995_vm3, %v1406_v32  ;;  %3345 = vmatprep.mubr.msk.f32.mxu1 %vm3777_vm2, %v3776_v45 }
 0x553   : > { %3353 = vmatprep.subr.mxu1 %v3776_v45 }
 0x555   : > { %3346 = vmatmul.mubr.msk.f32.vlgmr.msra.gmra.mrb[8].mxu1 %vm995_vm3, %v1404_v17  ;;  %v989_v17 = vld [vmem:[%s4051_s2 + $0x8] sm:$0xff] }
 0x556   : > { %3355 = vmatprep.mubr.msk.f32.mxu1 %vm3777_vm2, %v3776_v45 }
 0x578   : > { %v1165_v33 = vpop.xlane.xlu1 %1164 }
 0x579   : > { %3570 = vrcp.f32 %v1165_v33 }
 0x57c   : > { %v1328_v36 = vpop.permute.xlu1 %1327 }
 0x580   : > { %v1824_v8 = vpop.permute.xlu1 %1823 }
 0x583   : > { %v3571_v34 = vpop.eup %3570 }
 0x584   : > { %v1171_v35 = vmul.f32 %v3571_v34, %v3567_v27 }
 0x586   : > { %3331 = vmatmul.mubr.msk.f32.vlgmr.msra.gmra.mrb[0].mxu0 %vm995_vm3, %v1171_v35 }
 0x587   : > { %3339 = vmatpush3.xpose.msk.msra.mxu0 %vm995_vm3, %v1328_v36  ;;  %3340 = vmatprep.mubr.msk.f32.mxu0 %vm3777_vm2, %v3776_v45 }
 0x588   : > { %3348 = vmatprep.subr.mxu0 %v3776_v45 }
 0x58a   : > { %3341 = vmatmul.mubr.msk.f32.vlgmr.msra.gmra.mrb[2].mxu0 %vm995_vm3, %v1326_v37 }
 0x58b   : > { %3350 = vmatprep.mubr.msk.f32.mxu0 %vm3777_vm2, %v3776_v45 }
 0x624   : > { %v4187_v38 = vpop.f32.mrb[6].mxu1 }
 0x625   : > { %v3337_v39 = vpop.f32.mrb[7].mxu1 }
 0x628   : > { %v1477_v40 = vpop.f32.mrb[8].mxu1 }
 0x629   : > { %v1482_v41 = vmul.f32 0.35355338, %v1477_v40  ;;  %v3347_v43 = vpop.f32.mrb[9].mxu1 }
 0x62b   : > { %v1484_v46 = vadd.f32 %v1482_v41, %v4155_v10 }
 0x62d   : > { %v1488_v47 = vsel %vm995_vm3, %v1484_v46, -inf }
 0x62e   : > { %1489 = vmax.xlane.f32.xlu0 %v1488_v47  ;;  %v990_v47 = vld [vmem:[%s4051_s2 + $0x10] sm:$0xff] }
 0x644   : > { %1583 = vrot.lane.b32.xlu0 %v4132_v50, %s3784_s16 }
 0x648   : > { %1821 = vrot.lane.b32.xlu0 %v4129_v49, %s3785_s19 }
 0x64c   : > { %1901 = vrot.lane.b32.xlu0 %v4132_v50, %s3783_s0 }
 0x659   : > { %v4195_v48 = vpop.f32.mrb[0].mxu0 }
 0x65a   : > { %v3332_v51 = vpop.f32.mrb[1].mxu0 }
 0x65d   : > { %v1399_v52 = vpop.f32.mrb[2].mxu0 }
 0x65e   : > { %v3342_v53 = vpop.f32.mrb[3].mxu0  ;;  %v1481_v54 = vmul.f32 0.35355338, %v1399_v52 }
 0x660   : > { %v1483_v55 = vadd.f32 %v1481_v54, %v4152_v4 }
 0x662   : > { %v1485_v56 = vsel %vm995_vm3, %v1483_v55, -inf }
 0x66b   : > { %1486 = vmax.xlane.f32.xlu0 %v1485_v56 }
 0x681   : > { %1507 = vrot.lane.b32.xlu0 %v4129_v49, %s3784_s16 }
 0x685   : > { %2003 = vrot.lane.b32.xlu0 %v4129_v49, %s3786_s6 }
 0x689   : > { %2240 = vrot.lane.b32.xlu0 %v4129_v49, %s3787_s21 }
 0x68d   : > { %2318 = vrot.lane.b32.xlu0 %v4132_v50, %s3787_s21 }
 0x691   : > { %2238 = vrot.lane.b32.xlu0 %v4129_v49, %s3788_s8 }
 0x695   : > { %2316 = vrot.lane.b32.xlu0 %v4132_v50, %s3788_s8 }
 0x6bb   : > { %v1490_v57 = vpop.xlane.xlu0 %1489 }
 0x6bc   : > { %v1492_v58 = vsub.f32 %v1484_v46, %v1490_v57 }
 0x6be   : > { %v1495_v59 = vmul.f32 1.442695, %v1492_v58 }
 0x6bf   : > { %v1584_v60 = vpop.permute.xlu0 %1583 }
 0x6c0   : > { %3572 = vpow2.f32 %v1495_v59  ;;  %3354 = vmatpush3.msra.mxu1 %v1584_v60 }
 0x6c1   : > { %3368 = vmatprep.subr.mxu1 %v3776_v45 }
 0x6c3   : > { %v1822_v63 = vpop.permute.xlu0 %1821 }
 0x6c7   : > { %v1902_v0 = vpop.permute.xlu0 %1901 }
 0x6ca   : > { %v3573_v61 = vpop.eup %3572 }
 0x6cb   : > { %v1500_v62 = vsel %vm995_vm3, %v3573_v61, 0.0 }
 0x6cc   : > { %1501 = vadd.xlane.f32.xlu1 %v1500_v62 }
 0x6dd   : > { %1899 = vrot.lane.b32.xlu1 %v4132_v50, %s3785_s19 }
 0x6f8   : > { %v1487_v1 = vpop.xlane.xlu0 %1486 }
 0x6f9   : > { %v1491_v2 = vsub.f32 %v1483_v55, %v1487_v1 }
 0x6fb   : > { %v1493_v3 = vmul.f32 1.442695, %v1491_v2 }
 0x6fc   : > { %v1508_v5 = vpop.permute.xlu0 %1507 }
 0x6fd   : > { %3574 = vpow2.f32 %v1493_v3  ;;  %3349 = vmatpush3.msra.mxu0 %v1508_v5 }
 0x6fe   : > { %3358 = vmatprep.subr.mxu0 %v989_v17 }
 0x700   : > { %v2004_v33 = vpop.permute.xlu0 %2003 }
 0x704   : > { %v2241_v53 = vpop.permute.xlu0 %2240 }
 0x707   : > { %v3575_v6 = vpop.eup %3574 }
 0x708   : > { %v1497_v7 = vsel %vm995_vm3, %v3575_v6, 0.0  ;;  %v2319_v57 = vpop.permute.xlu0 %2318 }
 0x709   : > { %1498 = vadd.xlane.f32.xlu1 %v1497_v7 }
 0x70c   : > { %v2239_v59 = vpop.permute.xlu0 %2238 }
 0x759   : > { %v1502_v9 = vpop.xlane.xlu1 %1501 }
 0x75a   : > { %3576 = vrcp.f32 %v1502_v9 }
 0x75d   : > { %v1900_v13 = vpop.permute.xlu1 %1899 }
 0x764   : > { %v3577_v11 = vpop.eup %3576 }
 0x765   : > { %v1506_v12 = vmul.f32 %v3577_v11, %v3573_v61 }
 0x767   : > { %3356 = vmatmul.mubr.msk.f32.vlgmr.msra.gmra.mrb[10].mxu1 %vm995_vm3, %v1506_v12 }
 0x768   : > { %3369 = vmatpush3.xpose.msk.msra.mxu1 %vm995_vm3, %v1824_v8  ;;  %3370 = vmatprep.mubr.msk.f32.mxu1 %vm3777_vm2, %v3776_v45 }
 0x769   : > { %3373 = vmatprep.subr.mxu1 %v3776_v45 }
 0x76b   : > { %3371 = vmatmul.mubr.msk.f32.vlgmr.msra.gmra.mrb[12].mxu1 %vm995_vm3, %v1822_v63 }
 0x76c   : > { %3374 = vmatpush3.xpose.msk.msra.mxu1 %vm995_vm3, %v1902_v0  ;;  %3375 = vmatprep.mubr.msk.f32.mxu1 %vm3777_vm2, %v3776_v45  ;;  %v2317_v0 = vpop.permute.xlu0 %2316 }
 0x76d   : > { %3383 = vmatprep.subr.mxu1 %v3776_v45 }
 0x76f   : > { %3376 = vmatmul.mubr.msk.f32.vlgmr.msra.gmra.mrb[14].mxu1 %vm995_vm3, %v1900_v13 }
 0x770   : > { %3385 = vmatprep.mubr.msk.f32.mxu1 %vm3777_vm2, %v3776_v45 }
 0x796   : > { %v1499_v14 = vpop.xlane.xlu1 %1498 }
 0x797   : > { %3578 = vrcp.f32 %v1499_v14 }
 0x7a1   : > { %v3579_v15 = vpop.eup %3578 }
 0x7a2   : > { %v1505_v16 = vmul.f32 %v3579_v15, %v3575_v6 }
 0x7a4   : > { %3351 = vmatmul.mubr.msk.f32.vlgmr.msra.gmra.mrb[4].mxu0 %vm995_vm3, %v1505_v16 }
 0x7a5   : > { %3359 = vmatpush3.msra.mxu0 %v989_v17 }
 0x7a6   : > { %3363 = vmatprep.subr.mxu0 %v988_v18 }
 0x83a   : > { %v1655_v19 = vpop.f32.mrb[10].mxu1 }
 0x83b   : > { %v3357_v20 = vpop.f32.mrb[11].mxu1 }
 0x83e   : > { %v1895_v21 = vpop.f32.mrb[12].mxu1 }
 0x83f   : > { %v1977_v22 = vmul.f32 0.35355338, %v1895_v21  ;;  %v3372_v23 = vpop.f32.mrb[13].mxu1 }
 0x841   : > { %v1979_v24 = vadd.f32 %v1977_v22, %v4152_v4 }
 0x842   : > { %v1973_v25 = vpop.f32.mrb[14].mxu1 }
 0x843   : > { %v1978_v26 = vmul.f32 0.35355338, %v1973_v25  ;;  %v3377_v27 = vpop.f32.mrb[15].mxu1  ;;  %v1981_v28 = vsel %vm995_vm3, %v1979_v24, -inf }
 0x844   : > { %1982 = vmax.xlane.f32.xlu1 %v1981_v28 }
 0x845   : > { %v1980_v29 = vadd.f32 %v1978_v26, %v4155_v10 }
 0x847   : > { %v1984_v30 = vsel %vm995_vm3, %v1980_v29, -inf }
 0x848   : > { %1985 = vmax.xlane.f32.xlu1 %v1984_v30 }
 0x877   : > { %v1579_v31 = vpop.f32.mrb[4].mxu0 }
 0x878   : > { %v3352_v32 = vpop.f32.mrb[5].mxu0  ;;  %3360 = vmatprep.mubr.msk.f32.mxu0 %vm995_vm3, %v1579_v31 }
 0x879   : > { %3361 = vmatmul.mubr.msk.f32.vlgmr.msra.gmra.mrb[6].mxu0 %vm995_vm3, %v1655_v19 }
 0x87a   : > { %3365 = vmatprep.mubr.msk.f32.mxu0 %vm995_vm3, %v4195_v48  ;;  %3364 = vmatpush3.msra.mxu0 %v988_v18 }
 0x87b   : > { %3378 = vmatprep.subr.mxu0 %v3776_v45 }
 0x881   : > { %3366 = vmatmul.mubr.msk.f32.vlgmr.msra.gmra.mrb[6].mxu0 %vm995_vm3, %v4187_v38 }
 0x882   : > { %3379 = vmatpush3.msra.mxu0 %v2004_v33  ;;  %3380 = vmatprep.mubr.msk.f32.mxu0 %vm3777_vm2, %v3776_v45 }
 0x883   : > { %3388 = vmatprep.subr.mxu0 %v990_v47 }
 0x8d1   : > { %v1983_v34 = vpop.xlane.xlu1 %1982 }
 0x8d2   : > { %v1987_v35 = vsub.f32 %v1979_v24, %v1983_v34  ;;  %v991_v24 = vld [vmem:[%s4051_s2 + $0x18] sm:$0xff]  ;;  %s4430_s2 = scalar_lea.vmem %s4373_s9, %s4036_s18 }
 0x8d4   : > { %v1989_v36 = vmul.f32 1.442695, %v1987_v35 }
 0x8d5   : > { %v1986_v37 = vpop.xlane.xlu1 %1985 }
 0x8d6   : > { %3580 = vpow2.f32 %v1989_v36  ;;  %v1988_v39 = vsub.f32 %v1980_v29, %v1986_v37 }
 0x8d8   : > { %v1991_v40 = vmul.f32 1.442695, %v1988_v39 }
 0x8da   : > { %3582 = vpow2.f32 %v1991_v40 }
 0x8e0   : > { %v3581_v41 = vpop.eup %3580 }
 0x8e1   : > { %v1993_v43 = vsel %vm995_vm3, %v3581_v41, 0.0 }
 0x8e2   : > { %1994 = vadd.xlane.f32.xlu1 %v1993_v43 }
 0x8e4   : > { %v3583_v46 = vpop.eup %3582 }
 0x8e5   : > { %v1996_v38 = vsel %vm995_vm3, %v3583_v46, 0.0 }
 0x8e6   : > { %1997 = vadd.xlane.f32.xlu1 %v1996_v38 }
 0x8f7   : > { %2079 = vrot.lane.b32.xlu1 %v4132_v50, %s3786_s6 }
 0x96f   : > { %v1995_v48 = vpop.xlane.xlu1 %1994 }
 0x970   : > { %3584 = vrcp.f32 %v1995_v48 }
 0x973   : > { %v1998_v51 = vpop.xlane.xlu1 %1997 }
 0x974   : > { %3586 = vrcp.f32 %v1998_v51 }
 0x977   : > { %v2080_v52 = vpop.permute.xlu1 %2079 }
 0x978   : > { %3384 = vmatpush3.msra.mxu1 %v2080_v52 }
 0x979   : > { %3393 = vmatprep.subr.mxu1 %v3776_v45 }
 0x97a   : > { %v3585_v54 = vpop.eup %3584 }
 0x97b   : > { %v2001_v55 = vmul.f32 %v3585_v54, %v3581_v41  ;;  %v2712_v54 = vld [vmem:[%s4068_s4 + $0x8] sm:$0xff] }
 0x97d   : > { %3381 = vmatmul.mubr.msk.f32.vlgmr.msra.gmra.mrb[8].mxu0 %vm995_vm3, %v2001_v55 }
 0x97e   : > { %v3587_v56 = vpop.eup %3586  ;;  %3389 = vmatpush3.msra.mxu0 %v990_v47 }
 0x97f   : > { %v2002_v58 = vmul.f32 %v3587_v56, %v3583_v46  ;;  %3398 = vmatprep.subr.mxu0 %v3776_v45  ;;  %v2713_v56 = vld [vmem:[%s4068_s4 + $0x10] sm:$0xff] }
 0x981   : > { %3386 = vmatmul.mubr.msk.f32.vlgmr.msra.gmra.mrb[16].mxu1 %vm995_vm3, %v2002_v58 }
 0x982   : > { %3394 = vmatpush3.xpose.msk.msra.mxu1 %vm995_vm3, %v2241_v53  ;;  %3395 = vmatprep.mubr.msk.f32.mxu1 %vm3777_vm2, %v3776_v45  ;;  %v2711_v53 = vld [vmem:[%s4068_s4] sm:$0xff] }
 0x983   : > { %3403 = vmatprep.subr.mxu1 %v3776_v45  ;;  %v3456_v55 = vpack.c.bf16 %v2712_v54, %v2711_v53 }
 0x985   : > { %3396 = vmatmul.mubr.msk.f32.vlgmr.msra.gmra.mrb[18].mxu1 %vm995_vm3, %v2239_v59 }
 0x986   : > { %3405 = vmatprep.mubr.msk.f32.mxu1 %vm3777_vm2, %v3776_v45 }
 0xa50   : > { %v2075_v60 = vpop.f32.mrb[8].mxu0 }
 0xa51   : > { %v3382_v61 = vpop.f32.mrb[9].mxu0  ;;  %3390 = vmatprep.mubr.msk.f32.mxu0 %vm995_vm3, %v2075_v60 }
 0xa54   : > { %v2151_v62 = vpop.f32.mrb[16].mxu1 }
 0xa55   : > { %v3387_v63 = vpop.f32.mrb[17].mxu1  ;;  %3391 = vmatmul.mubr.msk.f32.vlgmr.msra.gmra.mrb[6].mxu0 %vm995_vm3, %v2151_v62 }
 0xa56   : > { %3399 = vmatpush3.xpose.msk.msra.mxu0 %vm995_vm3, %v2319_v57  ;;  %3400 = vmatprep.mubr.msk.f32.mxu0 %vm3777_vm2, %v3776_v45  ;;  %v2714_v57 = vld [vmem:[%s4068_s4 + $0x18] sm:$0xff]  ;;  %s4431_s4 = scalar_lea.vmem %s4374_s10, %s4036_s18 }
 0xa57   : > { %3408 = vmatprep.subr.mxu0 %v3776_v45  ;;  %v3460_v58 = vpack.c.bf16 %v2714_v57, %v2713_v56 }
 0xa58   : > { %v2312_v1 = vpop.f32.mrb[18].mxu1 }
 0xa59   : > { %v2394_v2 = vmul.f32 0.35355338, %v2312_v1  ;;  %v3397_v3 = vpop.f32.mrb[19].mxu1  ;;  %3401 = vmatmul.mubr.msk.f32.vlgmr.msra.gmra.mrb[10].mxu0 %vm995_vm3, %v2317_v0 }
 0xa5a   : > { %3410 = vmatprep.mubr.msk.f32.mxu0 %vm3777_vm2, %v3776_v45 }
 0xa5b   : > { %v2396_v5 = vadd.f32 %v2394_v2, %v4152_v4  ;;  %v3223_v2 = vld [vmem:[%s4431_s4] ss:$0 sm:$0xff] }
 0xa5d   : > { %v2398_v6 = vsel %vm995_vm3, %v2396_v5, -inf }
 0xa5e   : > { %2399 = vmax.xlane.f32.xlu1 %v2398_v6 }
 0xaeb   : > { %v2400_v7 = vpop.xlane.xlu1 %2399 }
 0xaec   : > { %v2404_v8 = vsub.f32 %v2396_v5, %v2400_v7  ;;  %v3224_v7 = vld [vmem:[%s4432_s24] ss:$0 sm:$0xff] }
 0xaee   : > { %v2406_v9 = vmul.f32 1.442695, %v2404_v8 }
 0xaf0   : > { %3588 = vpow2.f32 %v2406_v9 }
 0xafa   : > { %v3589_v16 = vpop.eup %3588 }
 0xafb   : > { %v2410_v45 = vsel %vm995_vm3, %v3589_v16, 0.0 }
 0xb2c   : > { %v2390_v11 = vpop.f32.mrb[10].mxu0 }
 0xb2d   : > { %v2395_v12 = vmul.f32 0.35355338, %v2390_v11  ;;  %v3402_v13 = vpop.f32.mrb[11].mxu0 }
 0xb2e   : > { %v2821_v13 = vld [vmem:[%s4078_s1] sm:$0xff] }
 0xb2f   : > { %v2397_v14 = vadd.f32 %v2395_v12, %v4155_v10 }
 0xb31   : > { %v2401_v15 = vsel %vm995_vm3, %v2397_v14, -inf }
 0xb32   : > { %2402 = vmax.xlane.f32.xlu0 %v2401_v15 }
 0xb36   : > { %2411 = vadd.xlane.f32.xlu0 %v2410_v45  ;;  %v2824_v45 = vld [vmem:[%s4078_s1 + $0x18] sm:$0xff] }
 0xb4c   : > { %2420 = vrot.lane.b32.xlu0 %v4129_v49, %s3789_s12 }
 0xbbf   : > { %v2403_v4 = vpop.xlane.xlu0 %2402 }
 0xbc0   : > { %v2405_v17 = vsub.f32 %v2397_v14, %v2403_v4  ;;  %v2822_v14 = vld [vmem:[%s4078_s1 + $0x8] sm:$0xff] }
 0xbc1   : > { %v3464_v15 = vpack.c.bf16 %v2822_v14, %v2821_v13  ;;  %v3232_v14 = vld [vmem:[%s788_s26] ss:$0 sm:$0xff] }
 0xbc2   : > { %v2408_v18 = vmul.f32 1.442695, %v2405_v17  ;;  %v2825_v17 = vld [vmem:[%s4078_s1 + $0x20] sm:$0xff] }
 0xbc3   : > { %v2412_v19 = vpop.xlane.xlu0 %2411 }
 0xbc4   : > { %3590 = vpow2.f32 %v2408_v18  ;;  %v2826_v18 = vld [vmem:[%s4078_s1 + $0x28] sm:$0xff] }
 0xbc5   : > { %3592 = vrcp.f32 %v2412_v19  ;;  %v3472_v19 = vpack.c.bf16 %v2826_v18, %v2825_v17 }
 0xbc7   : > { %v2421_v20 = vpop.permute.xlu0 %2420 }
 0xbc8   : > { %3404 = vmatpush3.msra.mxu1 %v2421_v20  ;;  %v2827_v20 = vld [vmem:[%s4078_s1 + $0x30] sm:$0xff] }
 0xbc9   : > { %3457 = vmatprep.subr.bf16.mxu1 %v3456_v55 }
 0xbce   : > { %v3591_v10 = vpop.eup %3590 }
 0xbcf   : > { %v3593_v21 = vpop.eup %3592  ;;  %v2413_v22 = vsel %vm995_vm3, %v3591_v10, 0.0 }
 0xbd0   : > { %v2418_v23 = vmul.f32 %v3593_v21, %v3589_v16  ;;  %2414 = vadd.xlane.f32.xlu1 %v2413_v22  ;;  %v2823_v16 = vld [vmem:[%s4078_s1 + $0x10] sm:$0xff]  ;;  %v3225_v22 = vld [vmem:[%s774_s5] ss:$0 sm:$0xff] }
 0xbd1   : > { %v3468_v4 = vpack.c.bf16 %v2824_v45, %v2823_v16 }
 0xbd2   : > { %3406 = vmatmul.mubr.msk.f32.vlgmr.msra.gmra.mrb[20].mxu1 %vm995_vm3, %v2418_v23 }
 0xbd3   : > { %3459 = vmatpush3.bf16.msra.mxu1 %v3456_v55 }
 0xbd4   : > { %3461 = vmatprep.subr.bf16.mxu1 %v3460_v58 }
 0xbd7   : > { %3463 = vmatpush3.bf16.msra.mxu1 %v3460_v58 }
 0xbe1   : > { %2496 = vrot.lane.b32.xlu1 %v4132_v50, %s3789_s12  ;;  %v3222_v50 = vld [vmem:[%s4430_s2] ss:$0 sm:$0xff] }
 0xc5d   : > { %v2415_v49 = vpop.xlane.xlu1 %2414 }
 0xc5e   : > { %3594 = vrcp.f32 %v2415_v49 }
 0xc61   : > { %v2497_v25 = vpop.permute.xlu1 %2496 }
 0xc62   : > { %3409 = vmatpush3.msra.mxu0 %v2497_v25 }
 0xc63   : > { %3413 = vmatprep.subr.mxu0 %v991_v24 }
 0xc68   : > { %v3595_v26 = vpop.eup %3594 }
 0xc69   : > { %v2419_v27 = vmul.f32 %v3595_v26, %v3591_v10  ;;  %v2828_v10 = vld [vmem:[%s4078_s1 + $0x38] sm:$0xff] }
 0xc6a   : > { %v3476_v21 = vpack.c.bf16 %v2828_v10, %v2827_v20 }
 0xc6b   : > { %3411 = vmatmul.mubr.msk.f32.vlgmr.msra.gmra.mrb[12].mxu0 %vm995_vm3, %v2419_v27 }
 0xc6c   : > { %3414 = vmatpush3.msra.mxu0 %v991_v24 }
 0xc6d   : > { %3465 = vmatprep.subr.bf16.mxu0 %v3464_v15 }
 0xca5   : > { %v2492_v28 = vpop.f32.mrb[20].mxu1 }
 0xca6   : > { %v3407_v29 = vpop.f32.mrb[21].mxu1  ;;  %3415 = vmatprep.mubr.msk.f32.mxu0 %vm995_vm3, %v2492_v28 }
 0xd3e   : > { %v2568_v30 = vpop.f32.mrb[12].mxu0 }
 0xd3f   : > { %v3412_v31 = vpop.f32.mrb[13].mxu0  ;;  %3416 = vmatmul.mubr.msk.f32.vlgmr.msra.gmra.mrb[6].mxu0 %vm995_vm3, %v2568_v30 }
 0xd40   : > { %3467 = vmatpush3.bf16.msra.mxu0 %v3464_v15 }
 0xd41   : > { %3469 = vmatprep.subr.bf16.mxu0 %v3468_v4 }
 0xd44   : > { %3471 = vmatpush3.bf16.msra.mxu0 %v3468_v4 }
 0xd45   : > { %3473 = vmatprep.subr.bf16.mxu0 %v3472_v19 }
 0xd48   : > { %3475 = vmatpush3.bf16.msra.mxu0 %v3472_v19 }
 0xd49   : > { %3477 = vmatprep.subr.bf16.mxu0 %v3476_v21 }
 0xd4c   : > { %3479 = vmatpush3.bf16.msra.mxu0 %v3476_v21 }
 0xe12   : > { %v3417_v32 = vpop.f32.mrb[6].mxu0 }
 0xe13   : > { %v2663_v33 = vadd.f32 %v3417_v32, %v3222_v50  ;;  %v2644_v34 = vpop.f32.mrb[7].mxu0 }
 0xe14   : > { %v2662_v35 = vadd.f32 %v3222_v50, %v2644_v34 }
 0xe15   : > { %v2665_v36 = vadd.f32 %v2663_v33, %v4114_v44 }
 0xe16   : > { %v2664_v37 = vadd.f32 %v2662_v35, %v4110_v42 }
 0xe17   : > { %v2671_v39 = vsel %vm869_vm1, %v2665_v36, 0.0 }
 0xe18   : > { %2672 = vadd.xlane.f32.xlu0 %v2671_v39  ;;  %v2668_v40 = vsel %vm869_vm1, %v2664_v37, 0.0 }
 0xe19   : > { %2669 = vadd.xlane.f32.xlu1 %v2668_v40 }
 0xea5   : > { %v2673_v41 = vpop.xlane.xlu0 %2672 }
 0xea6   : > { %v2676_v43 = vmul.f32 0.03125, %v2673_v41  ;;  %v2670_v46 = vpop.xlane.xlu1 %2669 }
 0xea7   : > { %v2675_v38 = vmul.f32 0.03125, %v2670_v46 }
 0xea8   : > { %v2678_v47 = vsub.f32 %v2665_v36, %v2676_v43 }
 0xea9   : > { %v2677_v48 = vsub.f32 %v2664_v37, %v2675_v38  ;;  %v3228_v38 = vld [vmem:[%s782_s20] ss:$0 sm:$0xff] }
 0xeaa   : > { %v2680_v51 = vmul.f32 %v2678_v47, %v2678_v47 }
 0xeab   : > { %v2679_v44 = vmul.f32 %v2677_v48, %v2677_v48 }
 0xeac   : > { %v2684_v42 = vsel %vm869_vm1, %v2680_v51, 0.0 }
 0xead   : > { %2685 = vadd.xlane.f32.xlu1 %v2684_v42  ;;  %v2681_v52 = vsel %vm869_vm1, %v2679_v44, 0.0 }
 0xeae   : > { %2682 = vadd.xlane.f32.xlu0 %v2681_v52 }
 0xf3a   : > { %v2686_v59 = vpop.xlane.xlu1 %2685 }
 0xf3b   : > { %v2688_v60 = vmul.f32 0.03125, %v2686_v59  ;;  %v2683_v61 = vpop.xlane.xlu0 %2682 }
 0xf3c   : > { %v2687_v62 = vmul.f32 0.03125, %v2683_v61 }
 0xf3d   : > { %v2690_v63 = vadd.f32 1e-05, %v2688_v60 }
 0xf3e   : > { %v2689_v0 = vadd.f32 1e-05, %v2687_v62 }
 0xf3f   : > { %3596 = vrsqrt.f32 %v2690_v63 }
 0xf40   : > { %3598 = vrsqrt.f32 %v2689_v0 }
 0xf49   : > { %v3597_v1 = vpop.eup %3596 }
 0xf4a   : > { %v3599_v3 = vpop.eup %3598  ;;  %v2694_v5 = vmul.f32 %v3597_v1, %v2678_v47 }
 0xf4b   : > { %v2693_v6 = vmul.f32 %v3599_v3, %v2677_v48 }
 0xf4c   : > { %v2702_v8 = vmul.f32 %v3223_v2, %v2694_v5 }
 0xf4d   : > { %v2701_v9 = vmul.f32 %v3223_v2, %v2693_v6 }
 0xf4e   : > { %v2710_v12 = vadd.f32 %v3224_v7, %v2702_v8 }
 0xf4f   : > { %v2709_v11 = vadd.f32 %v3224_v7, %v2701_v9  ;;  %v3231_v9 = vld [vmem:[%s785_s15] ss:$0 sm:$0xff]  ;;  %s3720_s15 = scalar_lea.vmem %s2973_s17, 256 }
 0xf50   : > { %p3721_p2 = scmp.ne.s32.totalorder %s2973_s17, %s3720_s15  ;;  %p3728_p13 = scmp.lt.s32.totalorder %s3720_s15, %s3720_s15 }
 0xf51   : > { %3426 = vmatprep.mubr.msk.f32.mxu1 %vm869_vm1, %v2709_v11 }
 0xf52   : > { %3427 = vmatmul.mubr.msk.f32.vlgmr.msra.gmra.mrb[22].mxu1 %vm869_vm1, %v2710_v12  ;;  %p3722_p10 = pnand %p3721_p2, %p3527_p9  ;;  %p3729_p0 = por %p3728_p13, %p3727_p12 }
 0xf54   : > { %p3723_p11 = pneg %p3722_p10 }
 0xf56   : > { %p3730_p8 = pnand %p3729_p0, %p3723_p11 }
0x1025   : > { %v3428_v23 = vpop.f32.mrb[22].mxu1 }
0x1026   : > { %v2800_v49 = vadd.f32 %v3428_v23, %v3225_v22  ;;  %v2794_v24 = vpop.f32.mrb[23].mxu1 }
0x1027   : > { %v2795_v25 = vadd.f32 %v3225_v22, %v2794_v24 }
0x1028   : > { %v2804_v26 = vmul.f32 %v2800_v49, %v2800_v49 }
0x1029   : > { %v2803_v27 = vmul.f32 %v2795_v25, %v2795_v25 }
0x102a   : > { %v2806_v28 = vmul.f32 %v2804_v26, %v2800_v49 }
0x102b   : > { %v2805_v29 = vmul.f32 %v2803_v27, %v2795_v25 }
0x102c   : > { %v2808_v30 = vmul.f32 0.044715, %v2806_v28 }
0x102d   : > { %v2807_v31 = vmul.f32 0.044715, %v2805_v29 }
0x102e   : > { %v2810_v50 = vadd.f32 %v2808_v30, %v2800_v49 }
0x102f   : > { %v2809_v32 = vadd.f32 %v2807_v31, %v2795_v25 }
0x1030   : > { %v2812_v33 = vmul.f32 0.7978846, %v2810_v50 }
0x1031   : > { %v2811_v34 = vmul.f32 0.7978846, %v2809_v32 }
0x1032   : > { %3600 = vtanh.f32 %v2812_v33 }
0x1033   : > { %3602 = vtanh.f32 %v2811_v34 }
0x103c   : > { %v3601_v35 = vpop.eup %3600 }
0x103d   : > { %v3603_v36 = vpop.eup %3602  ;;  %v2816_v37 = vadd.f32 1.0, %v3601_v35 }
0x103e   : > { %v2815_v39 = vadd.f32 1.0, %v3603_v36 }
0x103f   : > { %v2818_v40 = vmul.f32 0.5, %v2816_v37 }
0x1040   : > { %v2817_v41 = vmul.f32 0.5, %v2815_v39 }
0x1041   : > { %v2820_v46 = vmul.f32 %v2818_v40, %v2800_v49 }
0x1042   : > { %v2819_v43 = vmul.f32 %v2817_v41, %v2795_v25 }
0x1044   : > { %3445 = vmatprep.mubr.msk.f32.mxu0 %vm2836_vm4, %v2819_v43 }
0x1045   : > { %3446 = vmatmul.mubr.msk.f32.vlgmr.msra.gmra.mrb[14].mxu0 %vm2836_vm4, %v2820_v46 }
0x1118   : > { %v3447_v47 = vpop.f32.mrb[14].mxu0 }
0x1119   : > { %v2915_v48 = vadd.f32 %v3447_v47, %v3228_v38  ;;  %v2909_v51 = vpop.f32.mrb[15].mxu0 }
0x111a   : > { %v2910_v44 = vadd.f32 %v3228_v38, %v2909_v51 }
0x111b   : > { %v2919_v42 = vadd.f32 %v2915_v48, %v2710_v12 }
0x111c   : > { %v2918_v52 = vadd.f32 %v2910_v44, %v2709_v11 }
0x111d   : > { %v2925_v53 = vsel %vm869_vm1, %v2919_v42, 0.0 }
0x111e   : > { %2926 = vadd.xlane.f32.xlu1 %v2925_v53  ;;  %v2922_v54 = vsel %vm869_vm1, %v2918_v52, 0.0 }
0x111f   : > { %2923 = vadd.xlane.f32.xlu0 %v2922_v54 }
0x11ab   : > { %v2927_v55 = vpop.xlane.xlu1 %2926 }
0x11ac   : > { %v2929_v56 = vmul.f32 0.03125, %v2927_v55  ;;  %v2924_v57 = vpop.xlane.xlu0 %2923 }
0x11ad   : > { %v2928_v58 = vmul.f32 0.03125, %v2924_v57 }
0x11ae   : > { %v2931_v59 = vsub.f32 %v2919_v42, %v2929_v56 }
0x11af   : > { %v2930_v60 = vsub.f32 %v2918_v52, %v2928_v58 }
0x11b0   : > { %v2933_v61 = vmul.f32 %v2931_v59, %v2931_v59 }
0x11b1   : > { %v2932_v62 = vmul.f32 %v2930_v60, %v2930_v60 }
0x11b2   : > { %v2937_v63 = vsel %vm869_vm1, %v2933_v61, 0.0 }
0x11b3   : > { %2938 = vadd.xlane.f32.xlu1 %v2937_v63  ;;  %v2934_v0 = vsel %vm869_vm1, %v2932_v62, 0.0 }
0x11b4   : > { %2935 = vadd.xlane.f32.xlu0 %v2934_v0 }
0x1240   : > { %v2939_v1 = vpop.xlane.xlu1 %2938 }
0x1241   : > { %v2941_v2 = vmul.f32 0.03125, %v2939_v1  ;;  %v2936_v3 = vpop.xlane.xlu0 %2935 }
0x1242   : > { %v2940_v5 = vmul.f32 0.03125, %v2936_v3 }
0x1243   : > { %v2943_v6 = vadd.f32 1e-05, %v2941_v2 }
0x1244   : > { %v2942_v7 = vadd.f32 1e-05, %v2940_v5 }
0x1245   : > { %3604 = vrsqrt.f32 %v2943_v6 }
0x1246   : > { %3606 = vrsqrt.f32 %v2942_v7 }
0x124f   : > { %v3605_v8 = vpop.eup %3604 }
0x1250   : > { %v3607_v11 = vpop.eup %3606  ;;  %v2947_v12 = vmul.f32 %v3605_v8, %v2931_v59 }
0x1251   : > { %v2946_v13 = vmul.f32 %v3607_v11, %v2930_v60 }
0x1252   : > { %v2955_v15 = vmul.f32 %v3231_v9, %v2947_v12 }
0x1253   : > { %v2954_v16 = vmul.f32 %v3231_v9, %v2946_v13 }
0x1254   : > { %v2963_v45 = vadd.f32 %v3232_v14, %v2955_v15 }
0x1255   : > { %v2962_v4 = vadd.f32 %v3232_v14, %v2954_v16 }
0x1256   : > { %2965 = vst.msk [vmem:[#allocation10 + $0x8] sm:$0xff] %vm869_vm1, %v2963_v45 }
0x1257   : > { %2964 = vst.msk [vmem:[#allocation10] sm:$0xff] %vm869_vm1, %v2962_v4 }
0x1258   : > { %3733 = shalt.err (!%p3730_p8)
}
0x1259   : > { %s4436_s2 = sld [smem:[#allocation28_spill]] }
0x125f   : > { %s3734_s25 = scalar_lea.hbm %s4436_s2, 256 }
0x1260   : > { %p3735_p1 = scmp.ne.s32.totalorder %s4436_s2, %s3734_s25  ;;  %p3740_p6 = scmp.lt.u32.totalorder %s3734_s25, %s4436_s2 }
0x1262   : > { %p3736_p3 = pnand %p3735_p1, %p3527_p9 }
0x1264   : > { %p3737_p4 = pneg %p3736_p3 }
0x1266   : > { %p3742_p5 = pnand %p3740_p6, %p3737_p4 }
0x1268   : > { %3745 = shalt.err (!%p3742_p5)
}
0x1269   : > { %s3791_s24 = smov 128   ;;  %s3792_s23 = smov 8  }
0x126a   : > { %3503 = dma.vmem_to_hbm [thread:$0]  (%p3527_p9), %s2973_s17, 256, %s4436_s2, [#allocation4], %s3791_s24, %s3791_s24, %s3792_s23  }
0x126b   : > { %3763 = dma.done.wait (%p3527_p9), [#allocation4], 256  }
0x126c   : > { %3765 = vsyncadd (%p3527_p9), [#allocation4], 4294967040 }
0x126d PF: > { %s4437_s1 = sld [smem:[#allocation15_spill]] }
0x1273   : > { %s32_s27 = sadd.s32 1, %s4437_s1  }
0x1274   : > { %p29_p7 = scmp.ge.s32.totalorder %s32_s27, 4  }
0x1276   :  { %31 = sbr.rel (!%p29_p7) target bundleno = 18 (0x12), region = 173 }
0x127d   :  { %2988 = vsyncpa [#allocation3], 1 }
0x127e   :  { %2990 = vsyncpa [#allocation3 + $0x1], 1 }
0x127f   :  { %2991 = vsyncpa [#allocation6], 1 }
0x1280   :  { %2992 = vsyncpa [#allocation9], 1 }
0x1281   :  { %2993 = vsyncpa [#allocation4], 1 }
0x1282   :  { %2995 = vsyncpa [#allocation4 + $0x1], 1 }

</bundles_post_ra>
